<compile_context>
chip_gen: v6e
topology: v6e:2x2x1
jax: 0.10.0
libtpu: 0.0.40
codegen_flags: <defaults>
</compile_context>

<pallas_src>
import functools

import jax
import jax.numpy as jnp
import numpy as np
from jax import lax
from jax.experimental import pallas as pl
from jax.experimental.pallas import tpu as pltpu


OUT_LANES = 128   # lane-dense padded output width (real logits live in [:, :2])
HP = 128          # padded fused hidden width: lanes [0:H]=fwd, [H:2H]=rev, rest 0
GP = 3 * HP       # r|z|n gate blocks, each HP lanes wide


# ----------------------------- Pallas kernel --------------------------------
def _gru_classifier_kernel(
    tok_ref,    # (T*B, 1)  int32  time-major token ids: row t*B+b = tokens[b, t]
    len_ref,    # (B, 1)    int32  valid lengths
    embwf_ref,  # (V, GP)   f32    emb @ W_ih_fwd (gate-block layout) + all biases
    embwr_ref,  # (V, GP)   f32    emb @ W_ih_rev (gate-block layout)
    wh_ref,     # (HP, GP)  f32    hidden weights, block-diag fwd/rev per gate
    bhn_ref,    # (1, HP)   f32    b_hn (fwd|rev) — multiplied by r, kept separate
    fc1w_ref,   # (HP, OUT_LANES)        zero-padded
    fc1b_ref,   # (1, OUT_LANES)
    fc2w_ref,   # (OUT_LANES, OUT_LANES)
    fc2b_ref,   # (1, OUT_LANES)
    out_ref,    # (B, OUT_LANES)   lane-dense logits (real logits in [:, :2])
    gif_scr,    # (T*B, GP) VMEM scratch: fwd-direction input pre-activations
    gir_scr,    # (T*B, GP) VMEM scratch: rev-direction input pre-activations
    *,
    hidden_size,
):
    B = len_ref.shape[0]
    TB = tok_ref.shape[0]
    T = TB // B
    V = embwf_ref.shape[0]
    H = hidden_size

    # ---- fused in-kernel embedding gather + input projection ----------------
    # one-hot(tok) @ (emb @ W) == emb[tok] @ W.  One MXU pass per direction
    # covers all timesteps and all three gates.  Biases are pre-folded into the
    # fwd table (each one-hot row sums to exactly 1).
    onehot = (tok_ref[...] ==
              lax.broadcasted_iota(jnp.int32, (TB, V), 1)).astype(jnp.float32)
    gif_scr[...] = jnp.dot(onehot, embwf_ref[...],
                           preferred_element_type=jnp.float32)
    gir_scr[...] = jnp.dot(onehot, embwr_ref[...],
                           preferred_element_type=jnp.float32)

    b_hn = bhn_ref[...]                                           # (1, HP)

    # ---- packed-sequence keep-mask, hoisted out of the recurrence -----------
    # fwd lanes valid while t < len; rev lanes valid while (T-1-t) < len.
    lane = lax.broadcasted_iota(jnp.int32, (T, B, HP), 2)
    tt = lax.broadcasted_iota(jnp.int32, (T, B, HP), 0)
    eff_t = jnp.where(lane < H, tt, T - 1 - tt)
    keep = eff_t < len_ref[...][None, :, :]                       # (T, B, HP) bool

    # ---- fused bidirectional recurrence (fully unrolled, static T) ----------
    h = jnp.zeros((B, HP), jnp.float32)
    for t in range(T):
        lo_f = t * B
        lo_r = (T - 1 - t) * B
        gi = gif_scr[lo_f:lo_f + B, :] + gir_scr[lo_r:lo_r + B, :]        # (B, GP)
        # single MXU pass for all three hidden-gate matmuls (both directions)
        gh = jnp.dot(h, wh_ref[...], preferred_element_type=jnp.float32)  # (B, GP)
        rz = jax.nn.sigmoid(gi[:, :2 * HP] + gh[:, :2 * HP])      # one EUP pass
        r = rz[:, :HP]
        z = rz[:, HP:]
        n = jnp.tanh(gi[:, 2 * HP:] + r * (gh[:, 2 * HP:] + b_hn))
        h_new = (1.0 - z) * n + z * h
        h = jnp.where(keep[t], h_new, h)

    # ---- output MLP (h is already [h_fwd | h_rev | 0]; no concat needed) ----
    z1 = jnp.dot(h, fc1w_ref[...], preferred_element_type=jnp.float32) + fc1b_ref[...]
    z1 = jnp.maximum(z1, 0.0)
    out = jnp.dot(z1, fc2w_ref[...], preferred_element_type=jnp.float32) + fc2b_ref[...]
    out_ref[...] = out.astype(out_ref.dtype)


# ---------------------- one-time weight preprocessing ------------------------
def prepare_params(params):
    """Hoisted out of the per-call hot path: run once at init."""
    emb = params["embedding"].astype(jnp.float32)                 # (V, E)
    H = params["whh_f"].shape[1]
    F = params["fc1_w"].shape[0]
    E = emb.shape[1]

    def gate_rows(w):
        return w[:H], w[H:2 * H], w[2 * H:]

    wi_f = gate_rows(params["wih_f"])   # 3 x (H, E)
    wi_r = gate_rows(params["wih_r"])
    wh_f = gate_rows(params["whh_f"])   # 3 x (H, H)
    wh_r = gate_rows(params["whh_r"])
    bi_f = gate_rows(params["bih_f"])
    bi_r = gate_rows(params["bih_r"])
    bh_f = gate_rows(params["bhh_f"])
    bh_r = gate_rows(params["bhh_r"])

    # Input-projection tables in the padded gate-block layout.
    wif_big = jnp.zeros((E, GP), jnp.float32)
    wir_big = jnp.zeros((E, GP), jnp.float32)
    bias_all = jnp.zeros((GP,), jnp.float32)
    bf = (bi_f[0] + bh_f[0], bi_f[1] + bh_f[1], bi_f[2])   # r,z fold b_ih+b_hh; n only b_in
    br = (bi_r[0] + bh_r[0], bi_r[1] + bh_r[1], bi_r[2])
    for g in range(3):
        wif_big = wif_big.at[:, g * HP:g * HP + H].set(wi_f[g].T)
        wir_big = wir_big.at[:, g * HP + H:g * HP + 2 * H].set(wi_r[g].T)
        bias_all = bias_all.at[g * HP:g * HP + H].set(bf[g])
        bias_all = bias_all.at[g * HP + H:g * HP + 2 * H].set(br[g])

    # Fuse the embedding gather with the input projection (one-hot rows sum to 1,
    # so the bias can be folded straight into the fwd table).
    emb_wf = emb @ wif_big + bias_all[None, :]                    # (V, GP)
    emb_wr = emb @ wir_big                                        # (V, GP)

    # Hidden weights: one (HP, GP) matrix -> one MXU pass per recurrence step.
    wh_all = jnp.zeros((HP, GP), jnp.float32)
    for g in range(3):
        wh_all = wh_all.at[0:H, g * HP:g * HP + H].set(wh_f[g].T)
        wh_all = wh_all.at[H:2 * H, g * HP + H:g * HP + 2 * H].set(wh_r[g].T)

    b_hn = jnp.zeros((1, HP), jnp.float32)
    b_hn = b_hn.at[0, :H].set(bh_f[2]).at[0, H:2 * H].set(bh_r[2])

    # Lane-dense zero-padded output MLP weights (exact: pads are zero).
    fc1w = jnp.zeros((HP, OUT_LANES), jnp.float32).at[:2 * H, :F].set(params["fc1_w"].T)
    fc1b = jnp.zeros((1, OUT_LANES), jnp.float32).at[0, :F].set(params["fc1_b"])
    fc2w = jnp.zeros((OUT_LANES, OUT_LANES), jnp.float32).at[:F, :2].set(params["fc2_w"].T)
    fc2b = jnp.zeros((1, OUT_LANES), jnp.float32).at[0, :2].set(params["fc2_b"])

    return (emb_wf, emb_wr, wh_all, b_hn, fc1w, fc1b, fc2w, fc2b)


# ------------------------------ hot-path wrapper ------------------------------
def _full_spec(shape):
    ndim = len(shape)
    return pl.BlockSpec(shape, lambda i, _n=ndim: (0,) * _n)


def recurrent_classifier_forward(tokens, lengths, prepped, *, hidden_size):
    """tokens: (B,T) int32, lengths: (B,) int32. Returns (B,2) float32 logits."""
    B, T = tokens.shape
    # time-major token column: row t*B + b = tokens[b, t]   (tiny: B*T int32)
    tok_col = jnp.transpose(tokens.astype(jnp.int32)).reshape(T * B, 1)
    lens = lengths.astype(jnp.int32).reshape(B, 1)

    kernel_inputs = (tok_col, lens) + tuple(prepped)
    out_pad = pl.pallas_call(
        functools.partial(_gru_classifier_kernel, hidden_size=hidden_size),
        out_shape=jax.ShapeDtypeStruct((B, OUT_LANES), jnp.float32),
        grid=(1,),                                # whole problem in one VMEM block
        in_specs=[_full_spec(a.shape) for a in kernel_inputs],
        out_specs=_full_spec((B, OUT_LANES)),
        scratch_shapes=[pltpu.VMEM((T * B, GP), jnp.float32),
                        pltpu.VMEM((T * B, GP), jnp.float32)],
        compiler_params=pltpu.CompilerParams(
            dimension_semantics=("arbitrary",)),
    )(*kernel_inputs)
    return out_pad[:, :2]


# -------------------------- pure-JAX reference -------------------------------
def _reference_forward(tokens, lengths, params):
    emb = params["embedding"]
    x = jnp.take(emb, tokens, axis=0)               # (B, T, E)
    B, T, E = x.shape
    H = params["whh_f"].shape[1]
    t_idx = jnp.arange(T)[None, :]
    mask = (t_idx < lengths[:, None]).astype(jnp.float32)  # (B, T)

    def step(h, xt, m, wih, whh, bih, bhh):
        gi = xt @ wih.T + bih
        gh = h @ whh.T + bhh
        i_r, i_z, i_n = jnp.split(gi, 3, axis=1)
        h_r, h_z, h_n = jnp.split(gh, 3, axis=1)
        r = jax.nn.sigmoid(i_r + h_r)
        z = jax.nn.sigmoid(i_z + h_z)
        n = jnp.tanh(i_n + r * h_n)
        h_new = (1 - z) * n + z * h
        m = m[:, None]
        return m * h_new + (1 - m) * h

    hf = jnp.zeros((B, H), jnp.float32)
    for t in range(T):
        hf = step(hf, x[:, t], mask[:, t],
                  params["wih_f"], params["whh_f"], params["bih_f"], params["bhh_f"])
    hr = jnp.zeros((B, H), jnp.float32)
    for t in range(T - 1, -1, -1):
        hr = step(hr, x[:, t], mask[:, t],
                  params["wih_r"], params["whh_r"], params["bih_r"], params["bhh_r"])

    h = jnp.concatenate([hf, hr], axis=1)
    z1 = jnp.maximum(h @ params["fc1_w"].T + params["fc1_b"], 0.0)
    return z1 @ params["fc2_w"].T + params["fc2_b"]


# ------------------------------ main ------------------------------------------
if __name__ == "__main__":
    VOCAB, E, H, B, T = 64, 32, 32, 8, 8
    FC_HIDDEN = 40
    PAD_IDX = 0

    key = jax.random.PRNGKey(0)
    ks = jax.random.split(key, 16)

    def u(k, shape, scale):
        return jax.random.uniform(k, shape, jnp.float32, -scale, scale)

    s = 1.0 / np.sqrt(H)
    embedding = jax.random.normal(ks[0], (VOCAB, E), jnp.float32) * 0.1
    embedding = embedding.at[PAD_IDX].set(0.0)   # padding_idx row is zero

    params = {
        "embedding": embedding,
        # forward direction GRU weights (PyTorch layout: (3H, E) / (3H, H))
        "wih_f": u(ks[1], (3 * H, E), s), "whh_f": u(ks[2], (3 * H, H), s),
        "bih_f": u(ks[3], (3 * H,), s),   "bhh_f": u(ks[4], (3 * H,), s),
        # reverse direction
        "wih_r": u(ks[5], (3 * H, E), s), "whh_r": u(ks[6], (3 * H, H), s),
        "bih_r": u(ks[7], (3 * H,), s),   "bhh_r": u(ks[8], (3 * H,), s),
        # out_proj: Linear(2H, 40) -> ReLU -> Linear(40, 2)
        "fc1_w": u(ks[9], (FC_HIDDEN, 2 * H), 1.0 / np.sqrt(2 * H)),
        "fc1_b": u(ks[10], (FC_HIDDEN,), 1.0 / np.sqrt(2 * H)),
        "fc2_w": u(ks[11], (2, FC_HIDDEN), 1.0 / np.sqrt(FC_HIDDEN)),
        "fc2_b": u(ks[12], (2,), 1.0 / np.sqrt(FC_HIDDEN)),
    }

    # padded batch + lengths (equivalent information to a PackedSequence)
    lengths = jnp.array([8, 5, 3, 8, 1, 6, 7, 2], dtype=jnp.int32)
    tokens = jax.random.randint(ks[13], (B, T), 1, VOCAB, dtype=jnp.int32)
    t_idx = jnp.arange(T, dtype=jnp.int32)[None, :]
    tokens = jnp.where(t_idx < lengths[:, None], tokens, PAD_IDX)

    # one-time weight prep (outside the hot path)
    prepped = prepare_params(params)

    fwd = jax.jit(functools.partial(recurrent_classifier_forward, hidden_size=H))
    out = fwd(tokens, lengths, prepped)
    out = jax.block_until_ready(out)

    ref = _reference_forward(tokens, lengths, params)
    assert out.shape == (B, 2)
    # slightly loosened vs 1e-4: associativity differs (bias folds, fused gather
    # matmul) but any real precision bug would be ~1e-3.
    np.testing.assert_allclose(np.asarray(out), np.asarray(ref), rtol=2e-4, atol=2e-4)

    print("KERNEL_OK")
</pallas_src>

<mosaic_0001>
module attributes {stable_mosaic.version = 11 : i64} {
  func.func @_gru_classifier_kernel(%arg0: i32, %arg1: memref<64x1xi32, #tpu.memory_space<vmem>>, %arg2: memref<8x1xi32, #tpu.memory_space<vmem>>, %arg3: memref<64x384xf32, #tpu.memory_space<vmem>>, %arg4: memref<64x384xf32, #tpu.memory_space<vmem>>, %arg5: memref<128x384xf32, #tpu.memory_space<vmem>>, %arg6: memref<1x128xf32, #tpu.memory_space<vmem>>, %arg7: memref<128x128xf32, #tpu.memory_space<vmem>>, %arg8: memref<1x128xf32, #tpu.memory_space<vmem>>, %arg9: memref<128x128xf32, #tpu.memory_space<vmem>>, %arg10: memref<1x128xf32, #tpu.memory_space<vmem>>, %arg11: memref<8x128xf32, #tpu.memory_space<vmem>>, %arg12: memref<64x384xf32, #tpu.memory_space<vmem>>, %arg13: memref<64x384xf32, #tpu.memory_space<vmem>>) attributes {dimension_semantics = [#tpu.dimension_semantics<arbitrary>], iteration_bounds = array<i64: 1>, scalar_prefetch = 0 : i64, scratch_operands = 2 : i64, tpu.core_type = #tpu.core_type<tc>, window_params = [{pipeline_mode = #tpu.pipeline_mode<synchronous>, transform_indices = @transform_0, window_bounds = array<i64: 64, 1>}, {pipeline_mode = #tpu.pipeline_mode<synchronous>, transform_indices = @transform_1, window_bounds = array<i64: 8, 1>}, {pipeline_mode = #tpu.pipeline_mode<synchronous>, transform_indices = @transform_2, window_bounds = array<i64: 64, 384>}, {pipeline_mode = #tpu.pipeline_mode<synchronous>, transform_indices = @transform_3, window_bounds = array<i64: 64, 384>}, {pipeline_mode = #tpu.pipeline_mode<synchronous>, transform_indices = @transform_4, window_bounds = array<i64: 128, 384>}, {pipeline_mode = #tpu.pipeline_mode<synchronous>, transform_indices = @transform_5, window_bounds = array<i64: 1, 128>}, {pipeline_mode = #tpu.pipeline_mode<synchronous>, transform_indices = @transform_6, window_bounds = array<i64: 128, 128>}, {pipeline_mode = #tpu.pipeline_mode<synchronous>, transform_indices = @transform_7, window_bounds = array<i64: 1, 128>}, {pipeline_mode = #tpu.pipeline_mode<synchronous>, transform_indices = @transform_8, window_bounds = array<i64: 128, 128>}, {pipeline_mode = #tpu.pipeline_mode<synchronous>, transform_indices = @transform_9, window_bounds = array<i64: 1, 128>}, {pipeline_mode = #tpu.pipeline_mode<synchronous>, transform_indices = @transform_10, window_bounds = array<i64: 8, 128>}]} {
    %c0 = arith.constant 0 : index
    %c0_0 = arith.constant 0 : index
    %0 = vector.load %arg1[%c0, %c0_0] : memref<64x1xi32, #tpu.memory_space<vmem>>, vector<64x1xi32>
    %1 = tpu.iota {dimensions = array<i32: 1>} : vector<64x64xi32>
    %2 = vector.broadcast %0 : vector<64x1xi32> to vector<64x64xi32>
    %3 = arith.cmpi eq, %2, %1 : vector<64x64xi32>
    %4 = arith.extui %3 : vector<64x64xi1> to vector<64x64xi32>
    %5 = arith.sitofp %4 : vector<64x64xi32> to vector<64x64xf32>
    %c0_1 = arith.constant 0 : index
    %c0_2 = arith.constant 0 : index
    %6 = vector.load %arg3[%c0_1, %c0_2] : memref<64x384xf32, #tpu.memory_space<vmem>>, vector<64x384xf32>
    %cst = arith.constant dense<0.000000e+00> : vector<64x384xf32>
    %7 = tpu.matmul %5, %6, %cst {dimension_numbers = #tpu.dot_dimension_numbers<[1], [0], [0], [1], [0, 0, 1, 1], [], []>} : vector<64x64xf32>, vector<64x384xf32>, vector<64x384xf32> -> vector<64x384xf32>
    %c0_3 = arith.constant 0 : index
    %c0_4 = arith.constant 0 : index
    %8 = vector.load %arg12[%c0_3, %c0_4] : memref<64x384xf32, #tpu.memory_space<vmem>>, vector<64x384xf32>
    tpu.vector_store %arg12[%c0_3, %c0_4], %7 {strides = array<i32>} : memref<64x384xf32, #tpu.memory_space<vmem>>, vector<64x384xf32>,
    %c0_5 = arith.constant 0 : index
    %c0_6 = arith.constant 0 : index
    %9 = vector.load %arg4[%c0_5, %c0_6] : memref<64x384xf32, #tpu.memory_space<vmem>>, vector<64x384xf32>
    %cst_7 = arith.constant dense<0.000000e+00> : vector<64x384xf32>
    %10 = tpu.matmul %5, %9, %cst_7 {dimension_numbers = #tpu.dot_dimension_numbers<[1], [0], [0], [1], [0, 0, 1, 1], [], []>} : vector<64x64xf32>, vector<64x384xf32>, vector<64x384xf32> -> vector<64x384xf32>
    %c0_8 = arith.constant 0 : index
    %c0_9 = arith.constant 0 : index
    %11 = vector.load %arg13[%c0_8, %c0_9] : memref<64x384xf32, #tpu.memory_space<vmem>>, vector<64x384xf32>
    tpu.vector_store %arg13[%c0_8, %c0_9], %10 {strides = array<i32>} : memref<64x384xf32, #tpu.memory_space<vmem>>, vector<64x384xf32>,
    %c0_10 = arith.constant 0 : index
    %c0_11 = arith.constant 0 : index
    %12 = vector.load %arg6[%c0_10, %c0_11] : memref<1x128xf32, #tpu.memory_space<vmem>>, vector<1x128xf32>
    %13 = tpu.iota {dimensions = array<i32: 2>} : vector<8x8x128xi32>
    %14 = tpu.iota {dimensions = array<i32: 0>} : vector<8x8x128xi32>
    %c32_i32 = arith.constant 32 : i32
    %15 = vector.broadcast %c32_i32 : i32 to vector<8x8x128xi32>
    %16 = arith.cmpi slt, %13, %15 : vector<8x8x128xi32>
    %c7_i32 = arith.constant 7 : i32
    %17 = vector.broadcast %c7_i32 : i32 to vector<8x8x128xi32>
    %18 = arith.subi %17, %14 : vector<8x8x128xi32>
    %19 = arith.select %16, %14, %18 : vector<8x8x128xi1>, vector<8x8x128xi32>
    %c0_12 = arith.constant 0 : index
    %c0_13 = arith.constant 0 : index
    %20 = vector.load %arg2[%c0_12, %c0_13] : memref<8x1xi32, #tpu.memory_space<vmem>>, vector<8x1xi32>
    %21 = vector.shape_cast %20 : vector<8x1xi32> to vector<1x8x1xi32>
    %22 = vector.broadcast %21 : vector<1x8x1xi32> to vector<8x8x128xi32>
    %23 = arith.cmpi slt, %19, %22 : vector<8x8x128xi32>
    %cst_14 = arith.constant 0.000000e+00 : f32
    %24 = vector.broadcast %cst_14 : f32 to vector<8x128xf32>
    %c0_15 = arith.constant 0 : index
    %c0_16 = arith.constant 0 : index
    %25 = vector.load %arg12[%c0_15, %c0_16] : memref<64x384xf32, #tpu.memory_space<vmem>>, vector<8x384xf32>
    %c56 = arith.constant 56 : index
    %c0_17 = arith.constant 0 : index
    %26 = vector.load %arg13[%c56, %c0_17] : memref<64x384xf32, #tpu.memory_space<vmem>>, vector<8x384xf32>
    %27 = arith.addf %25, %26 : vector<8x384xf32>
    %c0_18 = arith.constant 0 : index
    %c0_19 = arith.constant 0 : index
    %28 = vector.load %arg5[%c0_18, %c0_19] : memref<128x384xf32, #tpu.memory_space<vmem>>, vector<128x384xf32>
    %cst_20 = arith.constant dense<0.000000e+00> : vector<8x384xf32>
    %29 = tpu.matmul %24, %28, %cst_20 {dimension_numbers = #tpu.dot_dimension_numbers<[1], [0], [0], [1], [0, 0, 1, 1], [], []>} : vector<8x128xf32>, vector<128x384xf32>, vector<8x384xf32> -> vector<8x384xf32>
    %30 = vector.extract_strided_slice %27 {offsets = [0, 0], sizes = [8, 256], strides = [1, 1]} : vector<8x384xf32> to vector<8x256xf32>
    %31 = vector.extract_strided_slice %29 {offsets = [0, 0], sizes = [8, 256], strides = [1, 1]} : vector<8x384xf32> to vector<8x256xf32>
    %32 = arith.addf %30, %31 : vector<8x256xf32>
    %33 = arith.negf %32 : vector<8x256xf32>
    %34 = math.exp %33 : vector<8x256xf32>
    %cst_21 = arith.constant 1.000000e+00 : f32
    %35 = vector.broadcast %cst_21 : f32 to vector<8x256xf32>
    %36 = arith.addf %35, %34 : vector<8x256xf32>
    %37 = arith.divf %35, %36 : vector<8x256xf32>
    %38 = vector.extract_strided_slice %37 {offsets = [0, 0], sizes = [8, 128], strides = [1, 1]} : vector<8x256xf32> to vector<8x128xf32>
    %39 = vector.extract_strided_slice %37 {offsets = [0, 128], sizes = [8, 128], strides = [1, 1]} : vector<8x256xf32> to vector<8x128xf32>
    %40 = vector.extract_strided_slice %27 {offsets = [0, 256], sizes = [8, 128], strides = [1, 1]} : vector<8x384xf32> to vector<8x128xf32>
    %41 = vector.extract_strided_slice %29 {offsets = [0, 256], sizes = [8, 128], strides = [1, 1]} : vector<8x384xf32> to vector<8x128xf32>
    %42 = vector.broadcast %12 : vector<1x128xf32> to vector<8x128xf32>
    %43 = arith.addf %41, %42 : vector<8x128xf32>
    %44 = arith.mulf %38, %43 : vector<8x128xf32>
    %45 = arith.addf %40, %44 : vector<8x128xf32>
    %46 = math.tanh %45 : vector<8x128xf32>
    %cst_22 = arith.constant 1.000000e+00 : f32
    %47 = vector.broadcast %cst_22 : f32 to vector<8x128xf32>
    %48 = arith.subf %47, %39 : vector<8x128xf32>
    %49 = arith.mulf %48, %46 : vector<8x128xf32>
    %50 = arith.mulf %39, %24 : vector<8x128xf32>
    %51 = arith.addf %49, %50 : vector<8x128xf32>
    %52 = vector.extract_strided_slice %23 {offsets = [0, 0, 0], sizes = [1, 8, 128], strides = [1, 1, 1]} : vector<8x8x128xi1> to vector<1x8x128xi1>
    %53 = vector.shape_cast %52 : vector<1x8x128xi1> to vector<8x128xi1>
    %54 = arith.select %53, %51, %24 : vector<8x128xi1>, vector<8x128xf32>
    %c8 = arith.constant 8 : index
    %c0_23 = arith.constant 0 : index
    %55 = vector.load %arg12[%c8, %c0_23] : memref<64x384xf32, #tpu.memory_space<vmem>>, vector<8x384xf32>
    %c48 = arith.constant 48 : index
    %c0_24 = arith.constant 0 : index
    %56 = vector.load %arg13[%c48, %c0_24] : memref<64x384xf32, #tpu.memory_space<vmem>>, vector<8x384xf32>
    %57 = arith.addf %55, %56 : vector<8x384xf32>
    %c0_25 = arith.constant 0 : index
    %c0_26 = arith.constant 0 : index
    %58 = vector.load %arg5[%c0_25, %c0_26] : memref<128x384xf32, #tpu.memory_space<vmem>>, vector<128x384xf32>
    %cst_27 = arith.constant dense<0.000000e+00> : vector<8x384xf32>
    %59 = tpu.matmul %54, %58, %cst_27 {dimension_numbers = #tpu.dot_dimension_numbers<[1], [0], [0], [1], [0, 0, 1, 1], [], []>} : vector<8x128xf32>, vector<128x384xf32>, vector<8x384xf32> -> vector<8x384xf32>
    %60 = vector.extract_strided_slice %57 {offsets = [0, 0], sizes = [8, 256], strides = [1, 1]} : vector<8x384xf32> to vector<8x256xf32>
    %61 = vector.extract_strided_slice %59 {offsets = [0, 0], sizes = [8, 256], strides = [1, 1]} : vector<8x384xf32> to vector<8x256xf32>
    %62 = arith.addf %60, %61 : vector<8x256xf32>
    %63 = arith.negf %62 : vector<8x256xf32>
    %64 = math.exp %63 : vector<8x256xf32>
    %cst_28 = arith.constant 1.000000e+00 : f32
    %65 = vector.broadcast %cst_28 : f32 to vector<8x256xf32>
    %66 = arith.addf %65, %64 : vector<8x256xf32>
    %67 = arith.divf %65, %66 : vector<8x256xf32>
    %68 = vector.extract_strided_slice %67 {offsets = [0, 0], sizes = [8, 128], strides = [1, 1]} : vector<8x256xf32> to vector<8x128xf32>
    %69 = vector.extract_strided_slice %67 {offsets = [0, 128], sizes = [8, 128], strides = [1, 1]} : vector<8x256xf32> to vector<8x128xf32>
    %70 = vector.extract_strided_slice %57 {offsets = [0, 256], sizes = [8, 128], strides = [1, 1]} : vector<8x384xf32> to vector<8x128xf32>
    %71 = vector.extract_strided_slice %59 {offsets = [0, 256], sizes = [8, 128], strides = [1, 1]} : vector<8x384xf32> to vector<8x128xf32>
    %72 = vector.broadcast %12 : vector<1x128xf32> to vector<8x128xf32>
    %73 = arith.addf %71, %72 : vector<8x128xf32>
    %74 = arith.mulf %68, %73 : vector<8x128xf32>
    %75 = arith.addf %70, %74 : vector<8x128xf32>
    %76 = math.tanh %75 : vector<8x128xf32>
    %cst_29 = arith.constant 1.000000e+00 : f32
    %77 = vector.broadcast %cst_29 : f32 to vector<8x128xf32>
    %78 = arith.subf %77, %69 : vector<8x128xf32>
    %79 = arith.mulf %78, %76 : vector<8x128xf32>
    %80 = arith.mulf %69, %54 : vector<8x128xf32>
    %81 = arith.addf %79, %80 : vector<8x128xf32>
    %82 = vector.extract_strided_slice %23 {offsets = [1, 0, 0], sizes = [1, 8, 128], strides = [1, 1, 1]} : vector<8x8x128xi1> to vector<1x8x128xi1>
    %83 = vector.shape_cast %82 : vector<1x8x128xi1> to vector<8x128xi1>
    %84 = arith.select %83, %81, %54 : vector<8x128xi1>, vector<8x128xf32>
    %c16 = arith.constant 16 : index
    %c0_30 = arith.constant 0 : index
    %85 = vector.load %arg12[%c16, %c0_30] : memref<64x384xf32, #tpu.memory_space<vmem>>, vector<8x384xf32>
    %c40 = arith.constant 40 : index
    %c0_31 = arith.constant 0 : index
    %86 = vector.load %arg13[%c40, %c0_31] : memref<64x384xf32, #tpu.memory_space<vmem>>, vector<8x384xf32>
    %87 = arith.addf %85, %86 : vector<8x384xf32>
    %c0_32 = arith.constant 0 : index
    %c0_33 = arith.constant 0 : index
    %88 = vector.load %arg5[%c0_32, %c0_33] : memref<128x384xf32, #tpu.memory_space<vmem>>, vector<128x384xf32>
    %cst_34 = arith.constant dense<0.000000e+00> : vector<8x384xf32>
    %89 = tpu.matmul %84, %88, %cst_34 {dimension_numbers = #tpu.dot_dimension_numbers<[1], [0], [0], [1], [0, 0, 1, 1], [], []>} : vector<8x128xf32>, vector<128x384xf32>, vector<8x384xf32> -> vector<8x384xf32>
    %90 = vector.extract_strided_slice %87 {offsets = [0, 0], sizes = [8, 256], strides = [1, 1]} : vector<8x384xf32> to vector<8x256xf32>
    %91 = vector.extract_strided_slice %89 {offsets = [0, 0], sizes = [8, 256], strides = [1, 1]} : vector<8x384xf32> to vector<8x256xf32>
    %92 = arith.addf %90, %91 : vector<8x256xf32>
    %93 = arith.negf %92 : vector<8x256xf32>
    %94 = math.exp %93 : vector<8x256xf32>
    %cst_35 = arith.constant 1.000000e+00 : f32
    %95 = vector.broadcast %cst_35 : f32 to vector<8x256xf32>
    %96 = arith.addf %95, %94 : vector<8x256xf32>
    %97 = arith.divf %95, %96 : vector<8x256xf32>
    %98 = vector.extract_strided_slice %97 {offsets = [0, 0], sizes = [8, 128], strides = [1, 1]} : vector<8x256xf32> to vector<8x128xf32>
    %99 = vector.extract_strided_slice %97 {offsets = [0, 128], sizes = [8, 128], strides = [1, 1]} : vector<8x256xf32> to vector<8x128xf32>
    %100 = vector.extract_strided_slice %87 {offsets = [0, 256], sizes = [8, 128], strides = [1, 1]} : vector<8x384xf32> to vector<8x128xf32>
    %101 = vector.extract_strided_slice %89 {offsets = [0, 256], sizes = [8, 128], strides = [1, 1]} : vector<8x384xf32> to vector<8x128xf32>
    %102 = vector.broadcast %12 : vector<1x128xf32> to vector<8x128xf32>
    %103 = arith.addf %101, %102 : vector<8x128xf32>
    %104 = arith.mulf %98, %103 : vector<8x128xf32>
    %105 = arith.addf %100, %104 : vector<8x128xf32>
    %106 = math.tanh %105 : vector<8x128xf32>
    %cst_36 = arith.constant 1.000000e+00 : f32
    %107 = vector.broadcast %cst_36 : f32 to vector<8x128xf32>
    %108 = arith.subf %107, %99 : vector<8x128xf32>
    %109 = arith.mulf %108, %106 : vector<8x128xf32>
    %110 = arith.mulf %99, %84 : vector<8x128xf32>
    %111 = arith.addf %109, %110 : vector<8x128xf32>
    %112 = vector.extract_strided_slice %23 {offsets = [2, 0, 0], sizes = [1, 8, 128], strides = [1, 1, 1]} : vector<8x8x128xi1> to vector<1x8x128xi1>
    %113 = vector.shape_cast %112 : vector<1x8x128xi1> to vector<8x128xi1>
    %114 = arith.select %113, %111, %84 : vector<8x128xi1>, vector<8x128xf32>
    %c24 = arith.constant 24 : index
    %c0_37 = arith.constant 0 : index
    %115 = vector.load %arg12[%c24, %c0_37] : memref<64x384xf32, #tpu.memory_space<vmem>>, vector<8x384xf32>
    %c32 = arith.constant 32 : index
    %c0_38 = arith.constant 0 : index
    %116 = vector.load %arg13[%c32, %c0_38] : memref<64x384xf32, #tpu.memory_space<vmem>>, vector<8x384xf32>
    %117 = arith.addf %115, %116 : vector<8x384xf32>
    %c0_39 = arith.constant 0 : index
    %c0_40 = arith.constant 0 : index
    %118 = vector.load %arg5[%c0_39, %c0_40] : memref<128x384xf32, #tpu.memory_space<vmem>>, vector<128x384xf32>
    %cst_41 = arith.constant dense<0.000000e+00> : vector<8x384xf32>
    %119 = tpu.matmul %114, %118, %cst_41 {dimension_numbers = #tpu.dot_dimension_numbers<[1], [0], [0], [1], [0, 0, 1, 1], [], []>} : vector<8x128xf32>, vector<128x384xf32>, vector<8x384xf32> -> vector<8x384xf32>
    %120 = vector.extract_strided_slice %117 {offsets = [0, 0], sizes = [8, 256], strides = [1, 1]} : vector<8x384xf32> to vector<8x256xf32>
    %121 = vector.extract_strided_slice %119 {offsets = [0, 0], sizes = [8, 256], strides = [1, 1]} : vector<8x384xf32> to vector<8x256xf32>
    %122 = arith.addf %120, %121 : vector<8x256xf32>
    %123 = arith.negf %122 : vector<8x256xf32>
    %124 = math.exp %123 : vector<8x256xf32>
    %cst_42 = arith.constant 1.000000e+00 : f32
    %125 = vector.broadcast %cst_42 : f32 to vector<8x256xf32>
    %126 = arith.addf %125, %124 : vector<8x256xf32>
    %127 = arith.divf %125, %126 : vector<8x256xf32>
    %128 = vector.extract_strided_slice %127 {offsets = [0, 0], sizes = [8, 128], strides = [1, 1]} : vector<8x256xf32> to vector<8x128xf32>
    %129 = vector.extract_strided_slice %127 {offsets = [0, 128], sizes = [8, 128], strides = [1, 1]} : vector<8x256xf32> to vector<8x128xf32>
    %130 = vector.extract_strided_slice %117 {offsets = [0, 256], sizes = [8, 128], strides = [1, 1]} : vector<8x384xf32> to vector<8x128xf32>
    %131 = vector.extract_strided_slice %119 {offsets = [0, 256], sizes = [8, 128], strides = [1, 1]} : vector<8x384xf32> to vector<8x128xf32>
    %132 = vector.broadcast %12 : vector<1x128xf32> to vector<8x128xf32>
    %133 = arith.addf %131, %132 : vector<8x128xf32>
    %134 = arith.mulf %128, %133 : vector<8x128xf32>
    %135 = arith.addf %130, %134 : vector<8x128xf32>
    %136 = math.tanh %135 : vector<8x128xf32>
    %cst_43 = arith.constant 1.000000e+00 : f32
    %137 = vector.broadcast %cst_43 : f32 to vector<8x128xf32>
    %138 = arith.subf %137, %129 : vector<8x128xf32>
    %139 = arith.mulf %138, %136 : vector<8x128xf32>
    %140 = arith.mulf %129, %114 : vector<8x128xf32>
    %141 = arith.addf %139, %140 : vector<8x128xf32>
    %142 = vector.extract_strided_slice %23 {offsets = [3, 0, 0], sizes = [1, 8, 128], strides = [1, 1, 1]} : vector<8x8x128xi1> to vector<1x8x128xi1>
    %143 = vector.shape_cast %142 : vector<1x8x128xi1> to vector<8x128xi1>
    %144 = arith.select %143, %141, %114 : vector<8x128xi1>, vector<8x128xf32>
    %c32_44 = arith.constant 32 : index
    %c0_45 = arith.constant 0 : index
    %145 = vector.load %arg12[%c32_44, %c0_45] : memref<64x384xf32, #tpu.memory_space<vmem>>, vector<8x384xf32>
    %c24_46 = arith.constant 24 : index
    %c0_47 = arith.constant 0 : index
    %146 = vector.load %arg13[%c24_46, %c0_47] : memref<64x384xf32, #tpu.memory_space<vmem>>, vector<8x384xf32>
    %147 = arith.addf %145, %146 : vector<8x384xf32>
    %c0_48 = arith.constant 0 : index
    %c0_49 = arith.constant 0 : index
    %148 = vector.load %arg5[%c0_48, %c0_49] : memref<128x384xf32, #tpu.memory_space<vmem>>, vector<128x384xf32>
    %cst_50 = arith.constant dense<0.000000e+00> : vector<8x384xf32>
    %149 = tpu.matmul %144, %148, %cst_50 {dimension_numbers = #tpu.dot_dimension_numbers<[1], [0], [0], [1], [0, 0, 1, 1], [], []>} : vector<8x128xf32>, vector<128x384xf32>, vector<8x384xf32> -> vector<8x384xf32>
    %150 = vector.extract_strided_slice %147 {offsets = [0, 0], sizes = [8, 256], strides = [1, 1]} : vector<8x384xf32> to vector<8x256xf32>
    %151 = vector.extract_strided_slice %149 {offsets = [0, 0], sizes = [8, 256], strides = [1, 1]} : vector<8x384xf32> to vector<8x256xf32>
    %152 = arith.addf %150, %151 : vector<8x256xf32>
    %153 = arith.negf %152 : vector<8x256xf32>
    %154 = math.exp %153 : vector<8x256xf32>
    %cst_51 = arith.constant 1.000000e+00 : f32
    %155 = vector.broadcast %cst_51 : f32 to vector<8x256xf32>
    %156 = arith.addf %155, %154 : vector<8x256xf32>
    %157 = arith.divf %155, %156 : vector<8x256xf32>
    %158 = vector.extract_strided_slice %157 {offsets = [0, 0], sizes = [8, 128], strides = [1, 1]} : vector<8x256xf32> to vector<8x128xf32>
    %159 = vector.extract_strided_slice %157 {offsets = [0, 128], sizes = [8, 128], strides = [1, 1]} : vector<8x256xf32> to vector<8x128xf32>
    %160 = vector.extract_strided_slice %147 {offsets = [0, 256], sizes = [8, 128], strides = [1, 1]} : vector<8x384xf32> to vector<8x128xf32>
    %161 = vector.extract_strided_slice %149 {offsets = [0, 256], sizes = [8, 128], strides = [1, 1]} : vector<8x384xf32> to vector<8x128xf32>
    %162 = vector.broadcast %12 : vector<1x128xf32> to vector<8x128xf32>
    %163 = arith.addf %161, %162 : vector<8x128xf32>
    %164 = arith.mulf %158, %163 : vector<8x128xf32>
    %165 = arith.addf %160, %164 : vector<8x128xf32>
    %166 = math.tanh %165 : vector<8x128xf32>
    %cst_52 = arith.constant 1.000000e+00 : f32
    %167 = vector.broadcast %cst_52 : f32 to vector<8x128xf32>
    %168 = arith.subf %167, %159 : vector<8x128xf32>
    %169 = arith.mulf %168, %166 : vector<8x128xf32>
    %170 = arith.mulf %159, %144 : vector<8x128xf32>
    %171 = arith.addf %169, %170 : vector<8x128xf32>
    %172 = vector.extract_strided_slice %23 {offsets = [4, 0, 0], sizes = [1, 8, 128], strides = [1, 1, 1]} : vector<8x8x128xi1> to vector<1x8x128xi1>
    %173 = vector.shape_cast %172 : vector<1x8x128xi1> to vector<8x128xi1>
    %174 = arith.select %173, %171, %144 : vector<8x128xi1>, vector<8x128xf32>
    %c40_53 = arith.constant 40 : index
    %c0_54 = arith.constant 0 : index
    %175 = vector.load %arg12[%c40_53, %c0_54] : memref<64x384xf32, #tpu.memory_space<vmem>>, vector<8x384xf32>
    %c16_55 = arith.constant 16 : index
    %c0_56 = arith.constant 0 : index
    %176 = vector.load %arg13[%c16_55, %c0_56] : memref<64x384xf32, #tpu.memory_space<vmem>>, vector<8x384xf32>
    %177 = arith.addf %175, %176 : vector<8x384xf32>
    %c0_57 = arith.constant 0 : index
    %c0_58 = arith.constant 0 : index
    %178 = vector.load %arg5[%c0_57, %c0_58] : memref<128x384xf32, #tpu.memory_space<vmem>>, vector<128x384xf32>
    %cst_59 = arith.constant dense<0.000000e+00> : vector<8x384xf32>
    %179 = tpu.matmul %174, %178, %cst_59 {dimension_numbers = #tpu.dot_dimension_numbers<[1], [0], [0], [1], [0, 0, 1, 1], [], []>} : vector<8x128xf32>, vector<128x384xf32>, vector<8x384xf32> -> vector<8x384xf32>
    %180 = vector.extract_strided_slice %177 {offsets = [0, 0], sizes = [8, 256], strides = [1, 1]} : vector<8x384xf32> to vector<8x256xf32>
    %181 = vector.extract_strided_slice %179 {offsets = [0, 0], sizes = [8, 256], strides = [1, 1]} : vector<8x384xf32> to vector<8x256xf32>
    %182 = arith.addf %180, %181 : vector<8x256xf32>
    %183 = arith.negf %182 : vector<8x256xf32>
    %184 = math.exp %183 : vector<8x256xf32>
    %cst_60 = arith.constant 1.000000e+00 : f32
    %185 = vector.broadcast %cst_60 : f32 to vector<8x256xf32>
    %186 = arith.addf %185, %184 : vector<8x256xf32>
    %187 = arith.divf %185, %186 : vector<8x256xf32>
    %188 = vector.extract_strided_slice %187 {offsets = [0, 0], sizes = [8, 128], strides = [1, 1]} : vector<8x256xf32> to vector<8x128xf32>
    %189 = vector.extract_strided_slice %187 {offsets = [0, 128], sizes = [8, 128], strides = [1, 1]} : vector<8x256xf32> to vector<8x128xf32>
    %190 = vector.extract_strided_slice %177 {offsets = [0, 256], sizes = [8, 128], strides = [1, 1]} : vector<8x384xf32> to vector<8x128xf32>
    %191 = vector.extract_strided_slice %179 {offsets = [0, 256], sizes = [8, 128], strides = [1, 1]} : vector<8x384xf32> to vector<8x128xf32>
    %192 = vector.broadcast %12 : vector<1x128xf32> to vector<8x128xf32>
    %193 = arith.addf %191, %192 : vector<8x128xf32>
    %194 = arith.mulf %188, %193 : vector<8x128xf32>
    %195 = arith.addf %190, %194 : vector<8x128xf32>
    %196 = math.tanh %195 : vector<8x128xf32>
    %cst_61 = arith.constant 1.000000e+00 : f32
    %197 = vector.broadcast %cst_61 : f32 to vector<8x128xf32>
    %198 = arith.subf %197, %189 : vector<8x128xf32>
    %199 = arith.mulf %198, %196 : vector<8x128xf32>
    %200 = arith.mulf %189, %174 : vector<8x128xf32>
    %201 = arith.addf %199, %200 : vector<8x128xf32>
    %202 = vector.extract_strided_slice %23 {offsets = [5, 0, 0], sizes = [1, 8, 128], strides = [1, 1, 1]} : vector<8x8x128xi1> to vector<1x8x128xi1>
    %203 = vector.shape_cast %202 : vector<1x8x128xi1> to vector<8x128xi1>
    %204 = arith.select %203, %201, %174 : vector<8x128xi1>, vector<8x128xf32>
    %c48_62 = arith.constant 48 : index
    %c0_63 = arith.constant 0 : index
    %205 = vector.load %arg12[%c48_62, %c0_63] : memref<64x384xf32, #tpu.memory_space<vmem>>, vector<8x384xf32>
    %c8_64 = arith.constant 8 : index
    %c0_65 = arith.constant 0 : index
    %206 = vector.load %arg13[%c8_64, %c0_65] : memref<64x384xf32, #tpu.memory_space<vmem>>, vector<8x384xf32>
    %207 = arith.addf %205, %206 : vector<8x384xf32>
    %c0_66 = arith.constant 0 : index
    %c0_67 = arith.constant 0 : index
    %208 = vector.load %arg5[%c0_66, %c0_67] : memref<128x384xf32, #tpu.memory_space<vmem>>, vector<128x384xf32>
    %cst_68 = arith.constant dense<0.000000e+00> : vector<8x384xf32>
    %209 = tpu.matmul %204, %208, %cst_68 {dimension_numbers = #tpu.dot_dimension_numbers<[1], [0], [0], [1], [0, 0, 1, 1], [], []>} : vector<8x128xf32>, vector<128x384xf32>, vector<8x384xf32> -> vector<8x384xf32>
    %210 = vector.extract_strided_slice %207 {offsets = [0, 0], sizes = [8, 256], strides = [1, 1]} : vector<8x384xf32> to vector<8x256xf32>
    %211 = vector.extract_strided_slice %209 {offsets = [0, 0], sizes = [8, 256], strides = [1, 1]} : vector<8x384xf32> to vector<8x256xf32>
    %212 = arith.addf %210, %211 : vector<8x256xf32>
    %213 = arith.negf %212 : vector<8x256xf32>
    %214 = math.exp %213 : vector<8x256xf32>
    %cst_69 = arith.constant 1.000000e+00 : f32
    %215 = vector.broadcast %cst_69 : f32 to vector<8x256xf32>
    %216 = arith.addf %215, %214 : vector<8x256xf32>
    %217 = arith.divf %215, %216 : vector<8x256xf32>
    %218 = vector.extract_strided_slice %217 {offsets = [0, 0], sizes = [8, 128], strides = [1, 1]} : vector<8x256xf32> to vector<8x128xf32>
    %219 = vector.extract_strided_slice %217 {offsets = [0, 128], sizes = [8, 128], strides = [1, 1]} : vector<8x256xf32> to vector<8x128xf32>
    %220 = vector.extract_strided_slice %207 {offsets = [0, 256], sizes = [8, 128], strides = [1, 1]} : vector<8x384xf32> to vector<8x128xf32>
    %221 = vector.extract_strided_slice %209 {offsets = [0, 256], sizes = [8, 128], strides = [1, 1]} : vector<8x384xf32> to vector<8x128xf32>
    %222 = vector.broadcast %12 : vector<1x128xf32> to vector<8x128xf32>
    %223 = arith.addf %221, %222 : vector<8x128xf32>
    %224 = arith.mulf %218, %223 : vector<8x128xf32>
    %225 = arith.addf %220, %224 : vector<8x128xf32>
    %226 = math.tanh %225 : vector<8x128xf32>
    %cst_70 = arith.constant 1.000000e+00 : f32
    %227 = vector.broadcast %cst_70 : f32 to vector<8x128xf32>
    %228 = arith.subf %227, %219 : vector<8x128xf32>
    %229 = arith.mulf %228, %226 : vector<8x128xf32>
    %230 = arith.mulf %219, %204 : vector<8x128xf32>
    %231 = arith.addf %229, %230 : vector<8x128xf32>
    %232 = vector.extract_strided_slice %23 {offsets = [6, 0, 0], sizes = [1, 8, 128], strides = [1, 1, 1]} : vector<8x8x128xi1> to vector<1x8x128xi1>
    %233 = vector.shape_cast %232 : vector<1x8x128xi1> to vector<8x128xi1>
    %234 = arith.select %233, %231, %204 : vector<8x128xi1>, vector<8x128xf32>
    %c56_71 = arith.constant 56 : index
    %c0_72 = arith.constant 0 : index
    %235 = vector.load %arg12[%c56_71, %c0_72] : memref<64x384xf32, #tpu.memory_space<vmem>>, vector<8x384xf32>
    %c0_73 = arith.constant 0 : index
    %c0_74 = arith.constant 0 : index
    %236 = vector.load %arg13[%c0_73, %c0_74] : memref<64x384xf32, #tpu.memory_space<vmem>>, vector<8x384xf32>
    %237 = arith.addf %235, %236 : vector<8x384xf32>
    %c0_75 = arith.constant 0 : index
    %c0_76 = arith.constant 0 : index
    %238 = vector.load %arg5[%c0_75, %c0_76] : memref<128x384xf32, #tpu.memory_space<vmem>>, vector<128x384xf32>
    %cst_77 = arith.constant dense<0.000000e+00> : vector<8x384xf32>
    %239 = tpu.matmul %234, %238, %cst_77 {dimension_numbers = #tpu.dot_dimension_numbers<[1], [0], [0], [1], [0, 0, 1, 1], [], []>} : vector<8x128xf32>, vector<128x384xf32>, vector<8x384xf32> -> vector<8x384xf32>
    %240 = vector.extract_strided_slice %237 {offsets = [0, 0], sizes = [8, 256], strides = [1, 1]} : vector<8x384xf32> to vector<8x256xf32>
    %241 = vector.extract_strided_slice %239 {offsets = [0, 0], sizes = [8, 256], strides = [1, 1]} : vector<8x384xf32> to vector<8x256xf32>
    %242 = arith.addf %240, %241 : vector<8x256xf32>
    %243 = arith.negf %242 : vector<8x256xf32>
    %244 = math.exp %243 : vector<8x256xf32>
    %cst_78 = arith.constant 1.000000e+00 : f32
    %245 = vector.broadcast %cst_78 : f32 to vector<8x256xf32>
    %246 = arith.addf %245, %244 : vector<8x256xf32>
    %247 = arith.divf %245, %246 : vector<8x256xf32>
    %248 = vector.extract_strided_slice %247 {offsets = [0, 0], sizes = [8, 128], strides = [1, 1]} : vector<8x256xf32> to vector<8x128xf32>
    %249 = vector.extract_strided_slice %247 {offsets = [0, 128], sizes = [8, 128], strides = [1, 1]} : vector<8x256xf32> to vector<8x128xf32>
    %250 = vector.extract_strided_slice %237 {offsets = [0, 256], sizes = [8, 128], strides = [1, 1]} : vector<8x384xf32> to vector<8x128xf32>
    %251 = vector.extract_strided_slice %239 {offsets = [0, 256], sizes = [8, 128], strides = [1, 1]} : vector<8x384xf32> to vector<8x128xf32>
    %252 = vector.broadcast %12 : vector<1x128xf32> to vector<8x128xf32>
    %253 = arith.addf %251, %252 : vector<8x128xf32>
    %254 = arith.mulf %248, %253 : vector<8x128xf32>
    %255 = arith.addf %250, %254 : vector<8x128xf32>
    %256 = math.tanh %255 : vector<8x128xf32>
    %cst_79 = arith.constant 1.000000e+00 : f32
    %257 = vector.broadcast %cst_79 : f32 to vector<8x128xf32>
    %258 = arith.subf %257, %249 : vector<8x128xf32>
    %259 = arith.mulf %258, %256 : vector<8x128xf32>
    %260 = arith.mulf %249, %234 : vector<8x128xf32>
    %261 = arith.addf %259, %260 : vector<8x128xf32>
    %262 = vector.extract_strided_slice %23 {offsets = [7, 0, 0], sizes = [1, 8, 128], strides = [1, 1, 1]} : vector<8x8x128xi1> to vector<1x8x128xi1>
    %263 = vector.shape_cast %262 : vector<1x8x128xi1> to vector<8x128xi1>
    %264 = arith.select %263, %261, %234 : vector<8x128xi1>, vector<8x128xf32>
    %c0_80 = arith.constant 0 : index
    %c0_81 = arith.constant 0 : index
    %265 = vector.load %arg7[%c0_80, %c0_81] : memref<128x128xf32, #tpu.memory_space<vmem>>, vector<128x128xf32>
    %cst_82 = arith.constant dense<0.000000e+00> : vector<8x128xf32>
    %266 = tpu.matmul %264, %265, %cst_82 {dimension_numbers = #tpu.dot_dimension_numbers<[1], [0], [0], [1], [0, 0, 1, 1], [], []>} : vector<8x128xf32>, vector<128x128xf32>, vector<8x128xf32> -> vector<8x128xf32>
    %c0_83 = arith.constant 0 : index
    %c0_84 = arith.constant 0 : index
    %267 = vector.load %arg8[%c0_83, %c0_84] : memref<1x128xf32, #tpu.memory_space<vmem>>, vector<1x128xf32>
    %268 = vector.broadcast %267 : vector<1x128xf32> to vector<8x128xf32>
    %269 = arith.addf %266, %268 : vector<8x128xf32>
    %cst_85 = arith.constant 0.000000e+00 : f32
    %270 = vector.broadcast %cst_85 : f32 to vector<8x128xf32>
    %271 = arith.maximumf %269, %270 : vector<8x128xf32>
    %c0_86 = arith.constant 0 : index
    %c0_87 = arith.constant 0 : index
    %272 = vector.load %arg9[%c0_86, %c0_87] : memref<128x128xf32, #tpu.memory_space<vmem>>, vector<128x128xf32>
    %cst_88 = arith.constant dense<0.000000e+00> : vector<8x128xf32>
    %273 = tpu.matmul %271, %272, %cst_88 {dimension_numbers = #tpu.dot_dimension_numbers<[1], [0], [0], [1], [0, 0, 1, 1], [], []>} : vector<8x128xf32>, vector<128x128xf32>, vector<8x128xf32> -> vector<8x128xf32>
    %c0_89 = arith.constant 0 : index
    %c0_90 = arith.constant 0 : index
    %274 = vector.load %arg10[%c0_89, %c0_90] : memref<1x128xf32, #tpu.memory_space<vmem>>, vector<1x128xf32>
    %275 = vector.broadcast %274 : vector<1x128xf32> to vector<8x128xf32>
    %276 = arith.addf %273, %275 : vector<8x128xf32>
    %c0_91 = arith.constant 0 : index
    %c0_92 = arith.constant 0 : index
    %277 = vector.load %arg11[%c0_91, %c0_92] : memref<8x128xf32, #tpu.memory_space<vmem>>, vector<8x128xf32>
    tpu.vector_store %arg11[%c0_91, %c0_92], %276 {strides = array<i32>} : memref<8x128xf32, #tpu.memory_space<vmem>>, vector<8x128xf32>,
    return
  }
  func.func @transform_0(%arg0: i32) -> (i32, i32) {
    %c0_i32 = arith.constant 0 : i32
    %c0_i32_0 = arith.constant 0 : i32
    %c0_i32_1 = arith.constant 0 : i32
    return %c0_i32, %c0_i32_0 : i32, i32
  }
  func.func @transform_1(%arg0: i32) -> (i32, i32) {
    %c0_i32 = arith.constant 0 : i32
    %c0_i32_0 = arith.constant 0 : i32
    %c0_i32_1 = arith.constant 0 : i32
    return %c0_i32, %c0_i32_0 : i32, i32
  }
  func.func @transform_2(%arg0: i32) -> (i32, i32) {
    %c0_i32 = arith.constant 0 : i32
    %c0_i32_0 = arith.constant 0 : i32
    %c0_i32_1 = arith.constant 0 : i32
    return %c0_i32, %c0_i32_0 : i32, i32
  }
  func.func @transform_3(%arg0: i32) -> (i32, i32) {
    %c0_i32 = arith.constant 0 : i32
    %c0_i32_0 = arith.constant 0 : i32
    %c0_i32_1 = arith.constant 0 : i32
    return %c0_i32, %c0_i32_0 : i32, i32
  }
  func.func @transform_4(%arg0: i32) -> (i32, i32) {
    %c0_i32 = arith.constant 0 : i32
    %c0_i32_0 = arith.constant 0 : i32
    %c0_i32_1 = arith.constant 0 : i32
    return %c0_i32, %c0_i32_0 : i32, i32
  }
  func.func @transform_5(%arg0: i32) -> (i32, i32) {
    %c0_i32 = arith.constant 0 : i32
    %c0_i32_0 = arith.constant 0 : i32
    %c0_i32_1 = arith.constant 0 : i32
    return %c0_i32, %c0_i32_0 : i32, i32
  }
  func.func @transform_6(%arg0: i32) -> (i32, i32) {
    %c0_i32 = arith.constant 0 : i32
    %c0_i32_0 = arith.constant 0 : i32
    %c0_i32_1 = arith.constant 0 : i32
    return %c0_i32, %c0_i32_0 : i32, i32
  }
  func.func @transform_7(%arg0: i32) -> (i32, i32) {
    %c0_i32 = arith.constant 0 : i32
    %c0_i32_0 = arith.constant 0 : i32
    %c0_i32_1 = arith.constant 0 : i32
    return %c0_i32, %c0_i32_0 : i32, i32
  }
  func.func @transform_8(%arg0: i32) -> (i32, i32) {
    %c0_i32 = arith.constant 0 : i32
    %c0_i32_0 = arith.constant 0 : i32
    %c0_i32_1 = arith.constant 0 : i32
    return %c0_i32, %c0_i32_0 : i32, i32
  }
  func.func @transform_9(%arg0: i32) -> (i32, i32) {
    %c0_i32 = arith.constant 0 : i32
    %c0_i32_0 = arith.constant 0 : i32
    %c0_i32_1 = arith.constant 0 : i32
    return %c0_i32, %c0_i32_0 : i32, i32
  }
  func.func @transform_10(%arg0: i32) -> (i32, i32) {
    %c0_i32 = arith.constant 0 : i32
    %c0_i32_0 = arith.constant 0 : i32
    %c0_i32_1 = arith.constant 0 : i32
    return %c0_i32, %c0_i32_0 : i32, i32
  }
}

</mosaic_0001>

<bundles_post_ra>
// kernel: recurrent_classifier_forward.1
= control target key start
LH: loop header
LB: loop body
LE: loop exit
PB: predicated region body
PF: predicated region fallthrough
CT: control target
= control target key end

     0   :  { %15 = vsyncpa [#allocation5], 0  ;;  %s4524_s0 = inlined_call_operand.vmem [shape: s32[64,1], index: 0, kind: input, shape index: {}]   ;;  %s4525_s1 = inlined_call_operand.vmem [shape: s32[8,1], index: 1, kind: input, shape index: {}]   ;;  %s4526_s2 = inlined_call_operand.hbm [shape: f32[64,384], index: 2, kind: input, shape index: {}]   ;;  %s4527_s3 = inlined_call_operand.hbm [shape: f32[64,384], index: 3, kind: input, shape index: {}]   ;;  %s4528_s4 = inlined_call_operand.hbm [shape: f32[128,384], index: 4, kind: input, shape index: {}]   ;;  %s4529_s5 = inlined_call_operand.vmem [shape: f32[1,128], index: 5, kind: input, shape index: {}]   ;;  %s4530_s6 = inlined_call_operand.hbm [shape: f32[128,128], index: 6, kind: input, shape index: {}]   ;;  %s4531_s7 = inlined_call_operand.vmem [shape: f32[1,128], index: 7, kind: input, shape index: {}]   ;;  %s4532_s8 = inlined_call_operand.hbm [shape: f32[128,128], index: 8, kind: input, shape index: {}]   ;;  %s4533_s9 = inlined_call_operand.vmem [shape: f32[1,128], index: 9, kind: input, shape index: {}]   ;;  %s4534_s10 = inlined_call_operand.vmem [shape: f32[8,128], index: 10, kind: output, shape index: {}]  }
   0x1   :  { %16 = vsyncpa [#allocation7], 0 }
   0x2   :  { %17 = vsyncpa [#allocation10], 0  ;;  %s3298_s13 = smov [#allocation6]   ;;  %s3299_s15 = smov [#allocation9]  }
   0x3   :  { %s39_s14 = sshll.u32 %s3298_s13, 4  ;;  %s65_s16 = sshll.u32 %s3299_s15, 4  ;;  %s40_s14 = int_to_ptr.vmem [resolvable:$true] %s39_s14  ;;  %s66_s16 = int_to_ptr.vmem [resolvable:$true] %s65_s16 }
   0x4   :  { %s3200_s17 = scalar_lea.vmem %s40_s14, 3072  ;;  %p3205_p1 = scmp.lt.s32.totalorder %s40_s14, %s40_s14 }
   0x5   :  { %p3201_p0 = scmp.ne.s32.totalorder %s40_s14, %s3200_s17  ;;  %p3206_p2 = scmp.lt.s32.totalorder %s3200_s17, %s3200_s17 }
   0x7   :  { %p3207_p3 = por %p3206_p2, %p3205_p1 }
   0x9   :  { %p3208_p4 = pnand %p3207_p3, %p3201_p0 }
   0xb   :  { %3211 = shalt.err (!%p3208_p4)
}
   0xc   :  { %s3300_s18 = smov 384   ;;  %s3301_s19 = smov 24  }
   0xd   :  { %45 = dma.hbm_to_vmem [thread:$0]  %s4527_s3, 3072, %s40_s14, [#allocation7], %s3300_s18, %s3300_s18, %s3301_s19  }
   0xe   :  { %s3220_s22 = scalar_lea.vmem %s66_s16, 2048  ;;  %p3225_p6 = scmp.lt.s32.totalorder %s66_s16, %s66_s16 }
   0xf   :  { %p3221_p5 = scmp.ne.s32.totalorder %s66_s16, %s3220_s22  ;;  %p3226_p7 = scmp.lt.s32.totalorder %s3220_s22, %s3220_s22 }
  0x11   :  { %p3227_p8 = por %p3226_p7, %p3225_p6 }
  0x13   :  { %p3228_p9 = pnand %p3227_p8, %p3221_p5 }
  0x15   :  { %3231 = shalt.err (!%p3228_p9)
}
  0x16   :  { %s3302_s23 = smov 128   ;;  %s3303_s24 = smov 8  }
  0x17   :  { %71 = dma.hbm_to_vmem [thread:$0]  %s4530_s6, 2048, %s66_s16, [#allocation10], %s3302_s23, %s3302_s23, %s3303_s24  }
  0x18   :  { %s3304_s27 = smov [#allocation4]   ;;  %s3305_s29 = smov [#allocation8]  }
  0x19   :  { %s27_s28 = sshll.u32 %s3304_s27, 4  ;;  %s51_s3 = sshll.u32 %s3305_s29, 4  ;;  %s28_s28 = int_to_ptr.vmem [resolvable:$true] %s27_s28  ;;  %s52_s3 = int_to_ptr.vmem [resolvable:$true] %s51_s3 }
  0x1a   :  { %s3240_s30 = scalar_lea.vmem %s28_s28, 3072  ;;  %p3245_p11 = scmp.lt.s32.totalorder %s28_s28, %s28_s28 }
  0x1b   :  { %p3241_p10 = scmp.ne.s32.totalorder %s28_s28, %s3240_s30  ;;  %p3246_p12 = scmp.lt.s32.totalorder %s3240_s30, %s3240_s30 }
  0x1d   :  { %p3247_p13 = por %p3246_p12, %p3245_p11 }
  0x1f   :  { %p3248_p0 = pnand %p3247_p13, %p3241_p10 }
  0x21   :  { %3251 = shalt.err (!%p3248_p0)
}
  0x22   :  { %33 = dma.hbm_to_vmem [thread:$0]  %s4526_s2, 3072, %s28_s28, [#allocation5], %s3300_s18, %s3300_s18, %s3301_s19  }
  0x23   :  { %s3260_s6 = scalar_lea.vmem %s52_s3, 6144  ;;  %p3265_p2 = scmp.lt.s32.totalorder %s52_s3, %s52_s3 }
  0x24   :  { %p3261_p1 = scmp.ne.s32.totalorder %s52_s3, %s3260_s6  ;;  %p3266_p3 = scmp.lt.s32.totalorder %s3260_s6, %s3260_s6 }
  0x26   :  { %p3267_p4 = por %p3266_p3, %p3265_p2 }
  0x28   :  { %p3268_p5 = pnand %p3267_p4, %p3261_p1 }
  0x2a   :  { %3271 = shalt.err (!%p3268_p5)
}
  0x2b   :  { %57 = dma.hbm_to_vmem [thread:$0]  %s4528_s4, 6144, %s52_s3, [#allocation7], %s3300_s18, %s3300_s18, %s3301_s19  }
  0x2c   :  { %s3306_s15 = smov [#allocation11]  }
  0x2d   :  { %s79_s16 = sshll.u32 %s3306_s15, 4  ;;  %s80_s16 = int_to_ptr.vmem [resolvable:$true] %s79_s16 }
  0x2e   :  { %s3280_s17 = scalar_lea.vmem %s80_s16, 2048  ;;  %p3285_p7 = scmp.lt.s32.totalorder %s80_s16, %s80_s16 }
  0x2f   :  { %p3281_p6 = scmp.ne.s32.totalorder %s80_s16, %s3280_s17  ;;  %p3286_p8 = scmp.lt.s32.totalorder %s3280_s17, %s3280_s17 }
  0x31   :  { %p3287_p9 = por %p3286_p8, %p3285_p7 }
  0x33   :  { %p3288_p10 = pnand %p3287_p9, %p3281_p6 }
  0x35   :  { %3291 = shalt.err (!%p3288_p10)
}
  0x36   :  { %85 = dma.hbm_to_vmem [thread:$0]  %s4532_s8, 2048, %s80_s16, [#allocation10], %s3302_s23, %s3302_s23, %s3303_s24  }
  0x37   :  { %3292 = dma.done.wait [#allocation5], 3072  }
  0x38   :  { %3293 = vsyncadd [#allocation5], 4294964224 }
  0x39   :  { %3294 = dma.done.wait [#allocation7], 9216  }
  0x3a   :  { %3295 = vsyncadd [#allocation7], 4294958080 }
  0x3b   :  { %3296 = dma.done.wait [#allocation10], 4096  }
  0x3c   :  { %3297 = vsyncadd [#allocation10], 4294963200  ;;  %v111_v0 = vlaneseq  ;;  %v3307_v1 = vmov 0   ;;  %v4546_v3 = vmov 0.0   ;;  %v105_v5 = vld [vmem:[%s4524_s0 + $0x10] sm:$0xff]  ;;  %v103_v6 = vld [vmem:[%s4524_s0] sm:$0xff] }
  0x3d   :  { %3062 = vset.pattern.permute.xlu1 %v3307_v1  ;;  %3061 = vset.pattern.permute.xlu0 %v3307_v1  ;;  %v106_v7 = vld [vmem:[%s4524_s0 + $0x18] sm:$0xff]  ;;  %v104_v8 = vld [vmem:[%s4524_s0 + $0x8] sm:$0xff]  ;;  %v183_v9 = vld [vmem:[#allocation4 + $0xb0] sm:$0xff]  ;;  %vm185_vm1 = vcmask 523264  }
  0x3e   :  { %v3402_v2 = vand.u32 127, %v111_v0  ;;  %274 = vmatprep.mubr.f32.mxu0 %v4546_v3  ;;  %120 = vperm.xlu1 %3062, %v105_v5   ;;  %v182_v10 = vld [vmem:[#allocation4 + $0xa8] sm:$0xff]  ;;  %v180_v11 = vld [vmem:[#allocation4 + $0x98] sm:$0xff]  ;;  %v179_v13 = vld [vmem:[#allocation4 + $0x90] sm:$0xff] }
  0x3f   :  { %114 = vperm.xlu0 %3061, %v103_v6   ;;  %226 = vmatprep.subr.mxu0 %v183_v9  ;;  %v184_v12 = vld [vmem:[#allocation4 + $0xb8] sm:$0xff]  ;;  %v181_v14 = vld [vmem:[#allocation4 + $0xa0] sm:$0xff]  ;;  %v108_v15 = vld [vmem:[%s4524_s0 + $0x28] sm:$0xff]  ;;  %v3310_v6 = vmov 5  }
  0x40   :  { %vm719_vm0 = vcmp.lt.s32.totalorder %v3402_v2, 32  ;;  %v107_v16 = vld [vmem:[%s4524_s0 + $0x20] sm:$0xff]  ;;  %227 = vmatpush1.msra.mxu0 %v182_v10  ;;  %2636 = vmatprep.subr.mxu1 %v184_v12  ;;  %v176_v18 = vld [vmem:[#allocation4 + $0x78] sm:$0xff]  ;;  %v178_v19 = vld [vmem:[#allocation4 + $0x88] sm:$0xff]  ;;  %v3311_v10 = vmov 4  }
  0x41   :  { %v3408_v4 = vsel %vm719_vm0, 7, %v3307_v1  ;;  %228 = vmatprep.subr.mxu0 %v180_v11  ;;  %v177_v17 = vld [vmem:[#allocation4 + $0x80] sm:$0xff]  ;;  %2637 = vmatpush3.msra.mxu1 %v184_v12  ;;  %v174_v20 = vld [vmem:[#allocation4 + $0x68] sm:$0xff]  ;;  %v110_v21 = vld [vmem:[%s4524_s0 + $0x38] sm:$0xff]  ;;  %v3309_v1 = vmov 6   ;;  %v3498_v11 = vsel %vm719_vm0, 3, %v3311_v10 }
  0x42   :  { %4597 = vst [vmem:[#allocation15_spill] sm:$0xff] %v3408_v4  ;;  %123 = vperm.xlu1 %3062, %v106_v7   ;;  %229 = vmatpush1.msra.mxu0 %v179_v13  ;;  %v109_v22 = vld [vmem:[%s4524_s0 + $0x30] sm:$0xff]  ;;  %v173_v23 = vld [vmem:[#allocation4 + $0x60] sm:$0xff]  ;;  %v170_v26 = vld [vmem:[#allocation4 + $0x48] sm:$0xff]  ;;  %v3483_v5 = vsel %vm719_vm0, 1, %v3309_v1  ;;  %v3487_v7 = vsel %vm719_vm0, 2, %v3310_v6 }
  0x43   :  { %117 = vperm.xlu0 %3061, %v104_v8   ;;  %2638 = vmatprep.subr.mxu1 %v181_v14  ;;  %v175_v24 = vld [vmem:[#allocation4 + $0x70] sm:$0xff]  ;;  %v172_v27 = vld [vmem:[#allocation4 + $0x58] sm:$0xff]  ;;  %v728_v28 = vld [vmem:[%s4525_s1] sm:$0xff]  ;;  %4598 = vst [vmem:[#allocation16_spill] sm:$0xff] %v3483_v5  ;;  %v3312_v12 = vmov 3  }
  0x44   :  { %230 = vmatprep.subr.mxu0 %v177_v17  ;;  %2639 = vmatpush3.msra.mxu1 %v181_v14  ;;  %v171_v25 = vld [vmem:[#allocation4 + $0x50] sm:$0xff]  ;;  %v168_v29 = vld [vmem:[#allocation4 + $0x38] sm:$0xff]  ;;  %v165_v31 = vld [vmem:[#allocation4 + $0x20] sm:$0xff]  ;;  %4599 = vst [vmem:[#allocation17_spill] sm:$0xff] %v3487_v7  ;;  %v3502_v13 = vsel %vm719_vm0, 4, %v3312_v12  ;;  %v3313_v14 = vmov 2  }
  0x45   :  { %231 = vmatpush1.msra.mxu0 %v176_v18  ;;  %2640 = vmatprep.subr.mxu1 %v178_v19  ;;  %v167_v30 = vld [vmem:[#allocation4 + $0x30] sm:$0xff]  ;;  %v169_v32 = vld [vmem:[#allocation4 + $0x40] sm:$0xff]  ;;  %v164_v33 = vld [vmem:[#allocation4 + $0x18] sm:$0xff]  ;;  %4600 = vst [vmem:[#allocation18_spill] sm:$0xff] %v3498_v11  ;;  %v3314_v18 = vmov 1  }
  0x46   :  { %129 = vperm.xlu1 %3062, %v108_v15   ;;  %232 = vmatprep.subr.mxu0 %v174_v20  ;;  %v162_v34 = vld [vmem:[#allocation4 + $0x8] sm:$0xff]  ;;  %v161_v36 = vld [vmem:[#allocation4] sm:$0xff]  ;;  %v163_v37 = vld [vmem:[#allocation4 + $0x10] sm:$0xff]  ;;  %4601 = vst [vmem:[#allocation19_spill] sm:$0xff] %v3502_v13  ;;  %v3506_v15 = vsel %vm719_vm0, 5, %v3313_v14 }
  0x47   :  { %126 = vperm.xlu0 %3061, %v107_v16   ;;  %2641 = vmatpush3.msra.mxu1 %v178_v19  ;;  %v166_v35 = vld [vmem:[#allocation4 + $0x28] sm:$0xff]  ;;  %v475_v38 = vld [vmem:[#allocation6 + $0xb8] sm:$0xff]  ;;  %v474_v39 = vld [vmem:[#allocation6 + $0xb0] sm:$0xff]  ;;  %4602 = vst [vmem:[#allocation20_spill] sm:$0xff] %v3506_v15  ;;  %v3515_v19 = vsel %vm719_vm0, 6, %v3314_v18 }
  0x48   :  { %233 = vmatpush1.msra.mxu0 %v173_v23  ;;  %2642 = vmatprep.subr.mxu1 %v175_v24  ;;  %v472_v43 = vld [vmem:[#allocation6 + $0xa0] sm:$0xff]  ;;  %v473_v47 = vld [vmem:[#allocation6 + $0xa8] sm:$0xff]  ;;  %v471_v49 = vld [vmem:[#allocation6 + $0x98] sm:$0xff]  ;;  %4603 = vst [vmem:[#allocation21_spill] sm:$0xff] %v3515_v19 }
  0x49   :  { %234 = vmatprep.subr.mxu0 %v171_v25  ;;  %2643 = vmatpush3.msra.mxu1 %v175_v24  ;;  %v470_v50 = vld [vmem:[#allocation6 + $0x90] sm:$0xff]  ;;  %v469_v51 = vld [vmem:[#allocation6 + $0x88] sm:$0xff]  ;;  %v468_v54 = vld [vmem:[#allocation6 + $0x80] sm:$0xff] }
  0x4a   :  { %135 = vperm.xlu1 %3062, %v110_v21   ;;  %235 = vmatpush1.msra.mxu0 %v170_v26  ;;  %v467_v56 = vld [vmem:[#allocation6 + $0x78] sm:$0xff]  ;;  %v465_v58 = vld [vmem:[#allocation6 + $0x68] sm:$0xff]  ;;  %v464_v60 = vld [vmem:[#allocation6 + $0x60] sm:$0xff] }
  0x4b   :  { %132 = vperm.xlu0 %3061, %v109_v22   ;;  %2644 = vmatprep.subr.mxu1 %v172_v27  ;;  %v462_v62 = vld [vmem:[#allocation6 + $0x50] sm:$0xff]  ;;  %v461_v0 = vld [vmem:[#allocation6 + $0x48] sm:$0xff]  ;;  %v459_v9 = vld [vmem:[#allocation6 + $0x38] sm:$0xff] }
  0x4c   :  { %236 = vmatprep.subr.mxu0 %v168_v29  ;;  %2645 = vmatpush3.msra.mxu1 %v172_v27  ;;  %v458_v17 = vld [vmem:[#allocation6 + $0x30] sm:$0xff]  ;;  %v456_v20 = vld [vmem:[#allocation6 + $0x20] sm:$0xff]  ;;  %v455_v21 = vld [vmem:[#allocation6 + $0x18] sm:$0xff] }
  0x4d   :  { %237 = vmatpush1.msra.mxu0 %v167_v30  ;;  %2646 = vmatprep.subr.mxu1 %v169_v32  ;;  %v453_v23 = vld [vmem:[#allocation6 + $0x8] sm:$0xff]  ;;  %v452_v24 = vld [vmem:[#allocation6] sm:$0xff]  ;;  %v3544_v25 = vld [vmem:[#allocation8 + $0x170] sm:$0xff] }
  0x4e   :  { %238 = vmatprep.subr.mxu0 %v165_v31  ;;  %2647 = vmatpush3.msra.mxu1 %v169_v32  ;;  %4604 = vst [vmem:[#allocation22_spill] sm:$0xff] %v3544_v25  ;;  %v3547_v26 = vld [vmem:[#allocation8 + $0x168] sm:$0xff]  ;;  %v466_v27 = vld [vmem:[#allocation6 + $0x70] sm:$0xff]  ;;  %v3559_v30 = vld [vmem:[#allocation8 + $0x140] sm:$0xff] }
  0x4f   :  { %730 = vperm.xlu0 %3061, %v728_v28   ;;  %239 = vmatpush1.msra.mxu0 %v164_v33  ;;  %v3551_v28 = vld [vmem:[#allocation8 + $0x158] sm:$0xff]  ;;  %v3556_v29 = vld [vmem:[#allocation8 + $0x150] sm:$0xff]  ;;  %v3568_v33 = vld [vmem:[#allocation8 + $0x128] sm:$0xff] }
  0x50   :  { %240 = vmatprep.subr.mxu0 %v162_v34  ;;  %2648 = vmatprep.subr.mxu1 %v166_v35  ;;  %v463_v31 = vld [vmem:[#allocation6 + $0x58] sm:$0xff]  ;;  %v460_v34 = vld [vmem:[#allocation6 + $0x40] sm:$0xff]  ;;  %v3701_v1 = vld [vmem:[#allocation8 + $0x130] sm:$0xff] }
  0x51   :  { %241 = vmatpush1.msra.mxu0 %v161_v36  ;;  %2649 = vmatpush3.msra.mxu1 %v166_v35  ;;  %v3565_v32 = vld [vmem:[#allocation8 + $0x138] sm:$0xff]  ;;  %v3574_v35 = vld [vmem:[#allocation8 + $0x120] sm:$0xff]  ;;  %v3578_v36 = vld [vmem:[#allocation8 + $0x110] sm:$0xff] }
  0x52   :  { %2650 = vmatprep.subr.mxu1 %v163_v37  ;;  %2664 = vmatprep.subr.mxu0 %v475_v38  ;;  %v3707_v6 = vld [vmem:[#allocation8 + $0x118] sm:$0xff]  ;;  %v3725_v10 = vld [vmem:[#allocation8 + $0xd0] sm:$0xff]  ;;  %v3737_v14 = vld [vmem:[#allocation8 + $0xa0] sm:$0xff] }
  0x53   :  { %2651 = vmatpush3.msra.mxu1 %v163_v37  ;;  %v457_v37 = vld [vmem:[#allocation6 + $0x28] sm:$0xff]  ;;  %v3731_v12 = vld [vmem:[#allocation8 + $0xb8] sm:$0xff]  ;;  %4621 = vst [vmem:[#allocation39_spill] sm:$0xff] %v3737_v14  ;;  %v3749_v18 = vld [vmem:[#allocation8 + $0x70] sm:$0xff] }
  0x54   :  { %492 = vmatprep.subr.mxu1 %v474_v39  ;;  %v3590_v39 = vld [vmem:[#allocation8 + $0xf8] sm:$0xff]  ;;  %4620 = vst [vmem:[#allocation38_spill] sm:$0xff] %v3731_v12  ;;  %4623 = vst [vmem:[#allocation41_spill] sm:$0xff] %v3749_v18 }
  0xb9   :  { %v121_v40 = vpop.permute.xlu1 %120 }
  0xba   :  { %v115_v41 = vpop.permute.xlu0 %114  ;;  %vm139_vm3 = vcmp.eq.s32.totalorder %v121_v40, %v3402_v2  ;;  %v454_v40 = vld [vmem:[#allocation6 + $0x10] sm:$0xff] }
  0xbb   :  { %vm137_vm2 = vcmp.eq.s32.totalorder %v115_v41, %v3402_v2  ;;  %v3448_v46 = vsel %vm139_vm3, 1.0, %v4546_v3  ;;  %v3593_v41 = vld [vmem:[#allocation8 + $0xf0] sm:$0xff] }
  0xbc   :  { %v3440_v42 = vsel %vm137_vm2, 1.0, %v4546_v3 }
  0xbd   :  { %2381 = vmatmul.mubr.msk.f32.vlgmr.msra.gmra.mxu0 %vm185_vm1, %v3440_v42  ;;  %2652 = vmatprep.mubr.msk.f32.mxu1 %vm185_vm1, %v3440_v42  ;;  %v124_v44 = vpop.permute.xlu1 %123 }
  0xbe   :  { %v118_v45 = vpop.permute.xlu0 %117  ;;  %280 = vmatprep.mubr.f32.mxu0 %v4546_v3  ;;  %2665 = vmatpush3.msra.mxu0 %v475_v38  ;;  %vm140_vm5 = vcmp.eq.s32.totalorder %v124_v44, %v3402_v2  ;;  %v3583_v38 = vld [vmem:[#allocation8 + $0x108] sm:$0xff]  ;;  %v3602_v44 = vld [vmem:[#allocation8 + $0xd8] sm:$0xff] }
  0xbf   :  { %vm138_vm4 = vcmp.eq.s32.totalorder %v118_v45, %v3402_v2  ;;  %2666 = vmatprep.subr.mxu0 %v472_v43  ;;  %v3467_v57 = vsel %vm140_vm5, 1.0, %v4546_v3  ;;  %v3605_v45 = vld [vmem:[#allocation8 + $0xc8] sm:$0xff] }
  0xc0   :  { %v3452_v48 = vsel %vm138_vm4, 1.0, %v4546_v3  ;;  %2667 = vmatpush3.msra.mxu0 %v472_v43  ;;  %v3597_v43 = vld [vmem:[#allocation8 + $0xe0] sm:$0xff] }
  0xc1   :  { %2382 = vmatmul.mubr.msk.f32.gmra.mxu0 %vm185_vm1, %v3452_v48  ;;  %2653 = vmatmul.mubr.msk.f32.vlgmr.msra.gmra.mxu1 %vm185_vm1, %v3452_v48  ;;  %v130_v52 = vpop.permute.xlu1 %129 }
  0xc2   :  { %493 = vmatpush1.msra.mxu1 %v473_v47  ;;  %2655 = vmatprep.mubr.msk.f32.mxu1 %vm185_vm1, %v3448_v46  ;;  %v127_v53 = vpop.permute.xlu0 %126  ;;  %vm142_vm7 = vcmp.eq.s32.totalorder %v130_v52, %v3402_v2  ;;  %v3616_v47 = vld [vmem:[#allocation8 + $0xb0] sm:$0xff]  ;;  %v3643_v52 = vld [vmem:[#allocation8 + $0x68] sm:$0xff] }
  0xc3   :  { %494 = vmatprep.subr.mxu1 %v471_v49  ;;  %vm141_vm6 = vcmp.eq.s32.totalorder %v127_v53, %v3402_v2  ;;  %286 = vmatprep.mubr.f32.mxu0 %v4546_v3  ;;  %v3492_v8 = vsel %vm142_vm7, 1.0, %v4546_v3  ;;  %v3620_v49 = vld [vmem:[#allocation8 + $0xa8] sm:$0xff]  ;;  %4610 = vst [vmem:[#allocation28_spill] sm:$0xff] %v3643_v52  ;;  %v3648_v53 = vld [vmem:[#allocation8 + $0x60] sm:$0xff] }
  0xc4   :  { %v3464_v55 = vsel %vm141_vm6, 1.0, %v4546_v3  ;;  %495 = vmatpush1.msra.mxu1 %v470_v50  ;;  %2668 = vmatprep.subr.mxu0 %v469_v51  ;;  %4605 = vst [vmem:[#allocation23_spill] sm:$0xff] %v3620_v49  ;;  %v3623_v50 = vld [vmem:[#allocation8 + $0x98] sm:$0xff]  ;;  %4611 = vst [vmem:[#allocation29_spill] sm:$0xff] %v3648_v53 }
  0xc5   :  { %496 = vmatprep.subr.mxu1 %v468_v54  ;;  %2383 = vmatmul.mubr.msk.f32.gmra.mxu0 %vm185_vm1, %v3448_v46  ;;  %v136_v61 = vpop.permute.xlu1 %135  ;;  %4606 = vst [vmem:[#allocation24_spill] sm:$0xff] %v3623_v50  ;;  %v3653_v54 = vld [vmem:[#allocation8 + $0x50] sm:$0xff] }
  0xc6   :  { %2656 = vmatmul.mubr.msk.f32.gmra.mxu1 %vm185_vm1, %v3467_v57  ;;  %v133_v59 = vpop.permute.xlu0 %132  ;;  %292 = vmatprep.mubr.f32.mxu0 %v4546_v3  ;;  %vm144_vm9 = vcmp.eq.s32.totalorder %v136_v61, %v3402_v2  ;;  %4612 = vst [vmem:[#allocation30_spill] sm:$0xff] %v3653_v54  ;;  %v3681_v61 = vld [vmem:[#allocation8 + $0x8] sm:$0xff] }
  0xc7   :  { %497 = vmatpush1.msra.mxu1 %v467_v56  ;;  %2658 = vmatprep.mubr.msk.f32.mxu1 %vm185_vm1, %v3464_v55  ;;  %vm143_vm8 = vcmp.eq.s32.totalorder %v133_v59, %v3402_v2  ;;  %v3533_v22 = vsel %vm144_vm9, 1.0, %v4546_v3  ;;  %v3662_v56 = vld [vmem:[#allocation8 + $0x38] sm:$0xff]  ;;  %v3674_v59 = vld [vmem:[#allocation8 + $0x20] sm:$0xff]  ;;  %4618 = vst [vmem:[#allocation36_spill] sm:$0xff] %v3681_v61 }
  0xc8   :  { %498 = vmatprep.subr.mxu1 %v465_v58  ;;  %v3479_v63 = vsel %vm143_vm8, 1.0, %v4546_v3  ;;  %2669 = vmatpush3.msra.mxu0 %v469_v51  ;;  %v3639_v51 = vld [vmem:[#allocation8 + $0x78] sm:$0xff]  ;;  %4614 = vst [vmem:[#allocation32_spill] sm:$0xff] %v3662_v56  ;;  %4616 = vst [vmem:[#allocation34_spill] sm:$0xff] %v3674_v59 }
  0xc9   :  { %499 = vmatpush1.msra.mxu1 %v464_v60  ;;  %2384 = vmatmul.mubr.msk.f32.gmra.mxu0 %vm185_vm1, %v3467_v57  ;;  %4609 = vst [vmem:[#allocation27_spill] sm:$0xff] %v3639_v51  ;;  %v3669_v58 = vld [vmem:[#allocation8 + $0x178] sm:$0xff] }
  0xca   :  { %500 = vmatprep.subr.mxu1 %v462_v62  ;;  %2659 = vmatmul.mubr.msk.f32.gmra.mxu1 %vm185_vm1, %v3492_v8  ;;  %v3511_v16 = vpop.permute.xlu0 %730  ;;  %v3678_v60 = vld [vmem:[#allocation8 + $0x18] sm:$0xff]  ;;  %v3687_v62 = vld [vmem:[#allocation8] sm:$0xff] }
  0xcb   :  { %501 = vmatpush1.msra.mxu1 %v461_v0  ;;  %2661 = vmatprep.mubr.msk.f32.mxu1 %vm185_vm1, %v3479_v63  ;;  %vm733_vm10 = vcmp.lt.s32.totalorder %v3483_v5, %v3511_v16  ;;  %vm734_vm11 = vcmp.lt.s32.totalorder %v3487_v7, %v3511_v16  ;;  %vm735_vm12 = vcmp.lt.s32.totalorder %v3498_v11, %v3511_v16  ;;  %v3695_v0 = vld [vmem:[#allocation8 + $0x148] sm:$0xff]  ;;  %v4647_v2 = vld [vmem:[#allocation23_spill] sm:$0xff] }
  0xcc   :  { %502 = vmatprep.subr.mxu1 %v459_v9  ;;  %298 = vmatprep.mubr.f32.mxu0 %v4546_v3  ;;  %vm736_vm13 = vcmp.lt.s32.totalorder %v3502_v13, %v3511_v16  ;;  %vm737_vm14 = vcmp.lt.s32.totalorder %v3506_v15, %v3511_v16  ;;  %vm738_vm15 = vcmp.lt.s32.totalorder %v3515_v19, %v3511_v16  ;;  %v3719_v9 = vld [vmem:[#allocation8 + $0xe8] sm:$0xff] }
  0xcd   :  { %503 = vmatpush1.msra.mxu1 %v458_v17  ;;  %2385 = vmatmul.mubr.msk.f32.gmra.mxu0 %vm185_vm1, %v3464_v55  ;;  %vm739_vm2 = vcmp.lt.s32.totalorder %v3408_v4, %v3511_v16  ;;  %4617 = vst [vmem:[#allocation35_spill] sm:$0xff] %v3678_v60  ;;  %4619 = vst [vmem:[#allocation37_spill] sm:$0xff] %v3687_v62  ;;  %v3743_v17 = vld [vmem:[#allocation8 + $0x88] sm:$0xff] }
  0xce   :  { %504 = vmatprep.subr.mxu1 %v456_v20  ;;  %2662 = vmatmul.mubr.msk.f32.gmra.mxu1 %vm185_vm1, %v3533_v22  ;;  %4622 = vst [vmem:[#allocation40_spill] sm:$0xff] %v3743_v17  ;;  %v3755_v20 = vld [vmem:[#allocation8 + $0x58] sm:$0xff] }
  0xcf   :  { %505 = vmatpush1.msra.mxu1 %v455_v21  ;;  %304 = vmatprep.mubr.f32.mxu0 %v4546_v3  ;;  %4624 = vst [vmem:[#allocation42_spill] sm:$0xff] %v3755_v20  ;;  %v3761_v21 = vld [vmem:[#allocation8 + $0x40] sm:$0xff] }
  0xd0   :  { %506 = vmatprep.subr.mxu1 %v453_v23  ;;  %540 = vmatprep.mubr.f32.mxu1 %v4546_v3  ;;  %4625 = vst [vmem:[#allocation43_spill] sm:$0xff] %v3761_v21  ;;  %v3773_v23 = vld [vmem:[#allocation8 + $0x10] sm:$0xff] }
  0xd1   :  { %507 = vmatpush1.msra.mxu1 %v452_v24  ;;  %2386 = vmatmul.mubr.msk.f32.gmra.mxu0 %vm185_vm1, %v3492_v8  ;;  %4627 = vst [vmem:[#allocation45_spill] sm:$0xff] %v3773_v23 }
  0xd2   :  { %797 = vmatprep.subr.mxu1 %v3544_v25  ;;  %2397 = vmatmul.mubr.msk.f32.vlgmr.msra.gmra.mxu1 %vm185_vm1, %v3440_v42 }
  0xd3   :  { %798 = vmatpush1.msra.mxu1 %v3547_v26  ;;  %2670 = vmatprep.subr.mxu0 %v466_v27 }
  0xd4   :  { %799 = vmatprep.subr.mxu1 %v3551_v28  ;;  %310 = vmatprep.mubr.f32.mxu0 %v4546_v3 }
  0xd5   :  { %800 = vmatpush1.msra.mxu1 %v3556_v29  ;;  %546 = vmatprep.mubr.f32.mxu1 %v4546_v3 }
  0xd6   :  { %2671 = vmatpush3.msra.mxu0 %v466_v27  ;;  %801 = vmatprep.subr.mxu1 %v3559_v30 }
  0xd7   :  { %2387 = vmatmul.mubr.msk.f32.gmra.mxu0 %vm185_vm1, %v3479_v63  ;;  %2398 = vmatmul.mubr.msk.f32.gmra.mxu1 %vm185_vm1, %v3452_v48 }
  0xd8   :  { %2672 = vmatprep.subr.mxu0 %v463_v31  ;;  %802 = vmatpush1.msra.mxu1 %v3565_v32 }
  0xd9   :  { %2673 = vmatpush3.msra.mxu0 %v463_v31  ;;  %803 = vmatprep.subr.mxu1 %v3568_v33 }
  0xda   :  { %2674 = vmatprep.subr.mxu0 %v460_v34  ;;  %804 = vmatpush1.msra.mxu1 %v3574_v35 }
  0xdb   :  { %316 = vmatprep.mubr.f32.mxu0 %v4546_v3  ;;  %552 = vmatprep.mubr.f32.mxu1 %v4546_v3 }
  0xdc   :  { %2675 = vmatpush3.msra.mxu0 %v460_v34  ;;  %805 = vmatprep.subr.mxu1 %v3578_v36 }
  0xdd   :  { %2388 = vmatmul.mubr.msk.f32.gmra.mxu0 %vm185_vm1, %v3533_v22  ;;  %2399 = vmatmul.mubr.msk.f32.gmra.mxu1 %vm185_vm1, %v3448_v46 }
  0xde   :  { %2676 = vmatprep.subr.mxu0 %v457_v37  ;;  %806 = vmatpush1.msra.mxu1 %v3583_v38 }
  0xdf   :  { %2677 = vmatpush3.msra.mxu0 %v457_v37  ;;  %2680 = vmatprep.mubr.msk.f32.mxu0 %vm185_vm1, %v3440_v42  ;;  %v3611_v42 = vld [vmem:[#allocation8 + $0xc0] sm:$0xff] }
  0xe0   :  { %807 = vmatprep.subr.mxu1 %v3590_v39  ;;  %2678 = vmatprep.subr.mxu0 %v454_v40 }
  0xe1   :  { %808 = vmatpush1.msra.mxu1 %v3593_v41  ;;  %558 = vmatprep.mubr.f32.mxu1 %v4546_v3 }
  0xe2   :  { %2679 = vmatpush3.msra.mxu0 %v454_v40  ;;  %809 = vmatprep.subr.mxu1 %v3597_v43 }
  0xe3   :  { %2400 = vmatmul.mubr.msk.f32.gmra.mxu1 %vm185_vm1, %v3467_v57  ;;  %2681 = vmatmul.mubr.msk.f32.vlgmr.msra.gmra.mxu0 %vm185_vm1, %v3452_v48  ;;  %v3634_v48 = vld [vmem:[#allocation8 + $0x80] sm:$0xff] }
  0xe4   :  { %810 = vmatpush1.msra.mxu1 %v3602_v44  ;;  %2683 = vmatprep.mubr.msk.f32.mxu0 %vm185_vm1, %v3448_v46  ;;  %v3629_v46 = vld [vmem:[#allocation8 + $0x90] sm:$0xff]  ;;  %4608 = vst [vmem:[#allocation26_spill] sm:$0xff] %v3634_v48 }
  0xe5   :  { %811 = vmatprep.subr.mxu1 %v3605_v45  ;;  %564 = vmatprep.mubr.f32.mxu1 %v4546_v3  ;;  %4607 = vst [vmem:[#allocation25_spill] sm:$0xff] %v3629_v46 }
  0xe6   :  { %812 = vmatpush1.msra.mxu1 %v3611_v42  ;;  %2692 = vmatprep.subr.mxu0 %v4546_v3 }
  0xe7   :  { %813 = vmatprep.subr.mxu1 %v3616_v47  ;;  %2401 = vmatmul.mubr.msk.f32.gmra.mxu1 %vm185_vm1, %v3464_v55 }
  0xe8   :  { %2684 = vmatmul.mubr.msk.f32.gmra.mxu0 %vm185_vm1, %v3467_v57  ;;  %814 = vmatpush1.msra.mxu1 %v3620_v49  ;;  %v3667_v57 = vld [vmem:[#allocation8 + $0x30] sm:$0xff] }
  0xe9   :  { %2686 = vmatprep.mubr.msk.f32.mxu0 %vm185_vm1, %v3464_v55  ;;  %815 = vmatprep.subr.mxu1 %v3623_v50  ;;  %v3658_v55 = vld [vmem:[#allocation8 + $0x48] sm:$0xff]  ;;  %4615 = vst [vmem:[#allocation33_spill] sm:$0xff] %v3667_v57 }
  0xea   :  { %816 = vmatpush1.msra.mxu1 %v3629_v46  ;;  %570 = vmatprep.mubr.f32.mxu1 %v4546_v3  ;;  %4613 = vst [vmem:[#allocation31_spill] sm:$0xff] %v3658_v55 }
  0xeb   :  { %817 = vmatprep.subr.mxu1 %v3634_v48  ;;  %2402 = vmatmul.mubr.msk.f32.gmra.mxu1 %vm185_vm1, %v3492_v8 }
  0xec   :  { %2687 = vmatmul.mubr.msk.f32.gmra.mxu0 %vm185_vm1, %v3492_v8  ;;  %818 = vmatpush1.msra.mxu1 %v3639_v51  ;;  %v3713_v8 = vld [vmem:[#allocation8 + $0x100] sm:$0xff] }
  0xed   :  { %2689 = vmatprep.mubr.msk.f32.mxu0 %vm185_vm1, %v3479_v63  ;;  %819 = vmatprep.subr.mxu1 %v3643_v52 }
  0xee   :  { %820 = vmatpush1.msra.mxu1 %v3648_v53  ;;  %576 = vmatprep.mubr.f32.mxu1 %v4546_v3 }
  0xef   :  { %821 = vmatprep.subr.mxu1 %v3653_v54  ;;  %2403 = vmatmul.mubr.msk.f32.gmra.mxu1 %vm185_vm1, %v3479_v63  ;;  %v3689_v63 = vld [vmem:[#allocation8 + $0x160] sm:$0xff] }
  0xf0   :  { %2690 = vmatmul.mubr.msk.f32.gmra.mxu0 %vm185_vm1, %v3533_v22  ;;  %822 = vmatpush1.msra.mxu1 %v3658_v55 }
  0xf1   :  { %823 = vmatprep.subr.mxu1 %v3662_v56  ;;  %582 = vmatprep.mubr.f32.mxu1 %v4546_v3 }
  0xf2   :  { %824 = vmatpush1.msra.mxu1 %v3667_v57  ;;  %2693 = vmatpush3.msra.mxu0 %v3669_v58 }
  0xf3   :  { %825 = vmatprep.subr.mxu1 %v3674_v59  ;;  %2404 = vmatmul.mubr.msk.f32.gmra.mxu1 %vm185_vm1, %v3533_v22  ;;  %vm3315_vm1 = vmmov 0   ;;  %v3767_v22 = vld [vmem:[#allocation8 + $0x28] sm:$0xff] }
  0xf4   :  { %826 = vmatpush1.msra.mxu1 %v3678_v60  ;;  %861 = vmatprep.mubr.f32.mxu1 %v4546_v3  ;;  %4626 = vst [vmem:[#allocation44_spill] sm:$0xff] %v3767_v22 }
  0xf5   :  { %827 = vmatprep.subr.mxu1 %v3681_v61  ;;  %2694 = vmatprep.subr.mxu0 %v4546_v3 }
  0xf6   :  { %828 = vmatpush1.msra.mxu1 %v3687_v62  ;;  %2695 = vmatpush3.msra.mxu0 %v3689_v63 }
  0xf7   :  { %862 = vmatmul.mubr.f32.vlgmr.msra.gmra.mxu1 %v4546_v3  ;;  %2696 = vmatprep.subr.mxu0 %v4546_v3 }
  0xf8   :  { %2697 = vmatpush3.msra.mxu0 %v3695_v0  ;;  %2724 = vmatprep.mubr.msk.f32.mxu0 %vm3315_vm1, %v4546_v3 }
  0xf9   :  { %2698 = vmatprep.subr.mxu0 %v4546_v3  ;;  %976 = vmatprep.subr.mxu1 %v3544_v25 }
  0xfa   :  { %2699 = vmatpush3.msra.mxu0 %v3701_v1  ;;  %977 = vmatpush1.msra.mxu1 %v3547_v26 }
  0xfb   :  { %2700 = vmatprep.subr.mxu0 %v4546_v3  ;;  %978 = vmatprep.subr.mxu1 %v3551_v28 }
  0xfc   :  { %2701 = vmatpush3.msra.mxu0 %v3707_v6  ;;  %979 = vmatpush1.msra.mxu1 %v3556_v29 }
  0xfd   :  { %2702 = vmatprep.subr.mxu0 %v4546_v3  ;;  %980 = vmatprep.subr.mxu1 %v3559_v30 }
  0xfe   :  { %2703 = vmatpush3.msra.mxu0 %v3713_v8  ;;  %981 = vmatpush1.msra.mxu1 %v3565_v32 }
  0xff   :  { %2704 = vmatprep.subr.mxu0 %v4546_v3  ;;  %982 = vmatprep.subr.mxu1 %v3568_v33 }
 0x100   :  { %2705 = vmatpush3.msra.mxu0 %v3719_v9  ;;  %983 = vmatpush1.msra.mxu1 %v3574_v35 }
 0x101   :  { %2706 = vmatprep.subr.mxu0 %v4546_v3  ;;  %984 = vmatprep.subr.mxu1 %v3578_v36 }
 0x102   :  { %2707 = vmatpush3.msra.mxu0 %v3725_v10  ;;  %985 = vmatpush1.msra.mxu1 %v3583_v38 }
 0x103   :  { %2708 = vmatprep.subr.mxu0 %v4546_v3  ;;  %986 = vmatprep.subr.mxu1 %v3590_v39 }
 0x104   :  { %2709 = vmatpush3.msra.mxu0 %v3731_v12  ;;  %987 = vmatpush1.msra.mxu1 %v3593_v41 }
 0x105   :  { %2710 = vmatprep.subr.mxu0 %v4546_v3  ;;  %988 = vmatprep.subr.mxu1 %v3597_v43 }
 0x106   :  { %2711 = vmatpush3.msra.mxu0 %v3737_v14  ;;  %989 = vmatpush1.msra.mxu1 %v3602_v44 }
 0x107   :  { %2712 = vmatprep.subr.mxu0 %v4546_v3  ;;  %990 = vmatprep.subr.mxu1 %v3605_v45 }
 0x108   :  { %2713 = vmatpush3.msra.mxu0 %v3743_v17  ;;  %991 = vmatpush1.msra.mxu1 %v3611_v42 }
 0x109   :  { %2714 = vmatprep.subr.mxu0 %v4546_v3  ;;  %992 = vmatprep.subr.mxu1 %v3616_v47 }
 0x10a   :  { %2715 = vmatpush3.msra.mxu0 %v3749_v18  ;;  %993 = vmatpush1.msra.mxu1 %v3620_v49 }
 0x10b   :  { %2716 = vmatprep.subr.mxu0 %v4546_v3  ;;  %994 = vmatprep.subr.mxu1 %v3623_v50 }
 0x10c   :  { %2717 = vmatpush3.msra.mxu0 %v3755_v20  ;;  %995 = vmatpush1.msra.mxu1 %v3629_v46 }
 0x10d   :  { %2718 = vmatprep.subr.mxu0 %v4546_v3  ;;  %996 = vmatprep.subr.mxu1 %v3634_v48 }
 0x10e   :  { %2719 = vmatpush3.msra.mxu0 %v3761_v21  ;;  %997 = vmatpush1.msra.mxu1 %v3639_v51 }
 0x10f   :  { %2720 = vmatprep.subr.mxu0 %v4546_v3  ;;  %998 = vmatprep.subr.mxu1 %v3643_v52 }
 0x110   :  { %2721 = vmatpush3.msra.mxu0 %v3767_v22  ;;  %999 = vmatpush1.msra.mxu1 %v3648_v53 }
 0x111   :  { %2722 = vmatprep.subr.mxu0 %v4546_v3  ;;  %1000 = vmatprep.subr.mxu1 %v3653_v54 }
 0x112   :  { %2723 = vmatpush3.msra.mxu0 %v3773_v23  ;;  %1001 = vmatpush1.msra.mxu1 %v3658_v55 }
 0x113   :  { %2725 = vmatmul.mubr.f32.vlgmr.msra.gmra.mxu0 %v4546_v3  ;;  %2727 = vmatprep.subr.mxu0 %v4546_v3 }
 0x114   :  { %2728 = vmatpush3.msra.mxu0 %v3669_v58  ;;  %1002 = vmatprep.subr.mxu1 %v3662_v56 }
 0x115   :  { %2729 = vmatprep.subr.mxu0 %v4546_v3  ;;  %1003 = vmatpush1.msra.mxu1 %v3667_v57 }
 0x116   :  { %2730 = vmatpush3.msra.mxu0 %v3689_v63  ;;  %1004 = vmatprep.subr.mxu1 %v3674_v59 }
 0x117   :  { %2731 = vmatprep.subr.mxu0 %v4546_v3  ;;  %1005 = vmatpush1.msra.mxu1 %v3678_v60 }
 0x118   :  { %2732 = vmatpush3.msra.mxu0 %v3695_v0  ;;  %1006 = vmatprep.subr.mxu1 %v3681_v61 }
 0x119   :  { %2733 = vmatprep.subr.mxu0 %v4546_v3  ;;  %1007 = vmatpush1.msra.mxu1 %v3687_v62 }
 0x11a   :  { %2734 = vmatpush3.msra.mxu0 %v3701_v1  ;;  %1040 = vmatprep.mubr.f32.mxu1 %v4546_v3 }
 0x11b   :  { %2735 = vmatprep.subr.mxu0 %v4546_v3  ;;  %2759 = vmatprep.mubr.msk.f32.mxu0 %vm3315_vm1, %v4546_v3 }
 0x11c   :  { %2736 = vmatpush3.msra.mxu0 %v3707_v6  ;;  %1149 = vmatprep.subr.mxu1 %v3544_v25 }
 0x11d   :  { %2737 = vmatprep.subr.mxu0 %v4546_v3 }
 0x11e   :  { %2738 = vmatpush3.msra.mxu0 %v3713_v8 }
 0x11f   :  { %2739 = vmatprep.subr.mxu0 %v4546_v3 }
 0x120   :  { %2740 = vmatpush3.msra.mxu0 %v3719_v9 }
 0x121   :  { %2741 = vmatprep.subr.mxu0 %v4546_v3 }
 0x122   :  { %2742 = vmatpush3.msra.mxu0 %v3725_v10 }
 0x123   :  { %2743 = vmatprep.subr.mxu0 %v4546_v3 }
 0x124   :  { %2744 = vmatpush3.msra.mxu0 %v3731_v12 }
 0x125   :  { %2745 = vmatprep.subr.mxu0 %v4546_v3 }
 0x126   :  { %2746 = vmatpush3.msra.mxu0 %v3737_v14 }
 0x127   :  { %2747 = vmatprep.subr.mxu0 %v4546_v3 }
 0x128   :  { %2748 = vmatpush3.msra.mxu0 %v3743_v17 }
 0x129   :  { %2749 = vmatprep.subr.mxu0 %v4546_v3 }
 0x12a   :  { %2750 = vmatpush3.msra.mxu0 %v3749_v18 }
 0x12b   :  { %2751 = vmatprep.subr.mxu0 %v4546_v3 }
 0x12c   :  { %2752 = vmatpush3.msra.mxu0 %v3755_v20 }
 0x12d   :  { %2753 = vmatprep.subr.mxu0 %v4546_v3 }
 0x12e   :  { %2754 = vmatpush3.msra.mxu0 %v3761_v21 }
 0x12f   :  { %2755 = vmatprep.subr.mxu0 %v4546_v3 }
 0x130   :  { %2756 = vmatpush3.msra.mxu0 %v3767_v22 }
 0x131   :  { %2757 = vmatprep.subr.mxu0 %v4546_v3 }
 0x132   :  { %2758 = vmatpush3.msra.mxu0 %v3773_v23 }
 0x133   :  { %2762 = vmatprep.subr.mxu0 %v4546_v3 }
 0x17d   :  { %v3826_v24 = vpop.f32.mrf.mxu0 }
 0x17f   :  { %v3828_v27 = vpop.f32.mrf.mxu0 }
 0x181   :  { %v282_v31 = vpop.f32.mrf.mxu0  ;;  %v3830_v34 = vpop.f32.mrf.mxu1 }
 0x183   :  { %v284_v37 = vpop.f32.mrf.mxu0  ;;  %v3832_v40 = vpop.f32.mrf.mxu1 }
 0x185   :  { %v288_v4 = vpop.f32.mrf.mxu0 }
 0x186   :  { %v2657_v19 = vpop.f32.mrf.mxu1 }
 0x187   :  { %v290_v15 = vpop.f32.mrf.mxu0 }
 0x188   :  { %v399_v13 = vpop.f32.mrf.mxu1 }
 0x189   :  { %v294_v11 = vpop.f32.mrf.mxu0 }
 0x18a   :  { %v2660_v7 = vpop.f32.mrf.mxu1 }
 0x18b   :  { %v296_v5 = vpop.f32.mrf.mxu0 }
 0x18c   :  { %v409_v25 = vpop.f32.mrf.mxu1 }
 0x18d   :  { %v300_v23 = vpop.f32.mrf.mxu0 }
 0x18e   :  { %v2663_v3 = vpop.f32.mrf.mxu1 }
 0x18f   :  { %v302_v62 = vpop.f32.mrf.mxu0 }
 0x190   :  { %v419_v61 = vpop.f32.mrf.mxu1 }
 0x191   :  { %v306_v22 = vpop.f32.mrf.mxu0 }
 0x192   :  { %v542_v60 = vpop.f32.mrf.mxu1 }
 0x193   :  { %v308_v59 = vpop.f32.mrf.mxu0 }
 0x194   :  { %v544_v21 = vpop.f32.mrf.mxu1 }
 0x197   :  { %v312_v57 = vpop.f32.mrf.mxu0  ;;  %v548_v56 = vpop.f32.mrf.mxu1 }
 0x198   :  { %v3834_v20 = vadd.f32 %v548_v56, %v312_v57 }
 0x199   :  { %v314_v55 = vpop.f32.mrf.mxu0  ;;  %v550_v54 = vpop.f32.mrf.mxu1 }
 0x19a   :  { %4628 = vst [vmem:[#allocation46_spill] sm:$0xff] %v3834_v20  ;;  %v3836_v18 = vadd.f32 %v550_v54, %v314_v55  ;;  %v4667_v20 = vld [vmem:[#allocation36_spill] sm:$0xff] }
 0x19c   :  { %4629 = vst [vmem:[#allocation47_spill] sm:$0xff] %v3836_v18 }
 0x19d   :  { %v318_v53 = vpop.f32.mrf.mxu0  ;;  %v554_v52 = vpop.f32.mrf.mxu1 }
 0x19e   :  { %v3838_v17 = vadd.f32 %v542_v60, %v318_v53  ;;  %v3840_v51 = vadd.f32 %v554_v52, %v306_v22 }
 0x19f   :  { %v320_v48 = vpop.f32.mrf.mxu0  ;;  %v556_v14 = vpop.f32.mrf.mxu1 }
 0x1a0   :  { %4630 = vst [vmem:[#allocation48_spill] sm:$0xff] %v3838_v17  ;;  %4631 = vst [vmem:[#allocation49_spill] sm:$0xff] %v3840_v51  ;;  %v3842_v46 = vadd.f32 %v544_v21, %v320_v48  ;;  %v3844_v50 = vadd.f32 %v556_v14, %v308_v59  ;;  %v4665_v17 = vld [vmem:[#allocation35_spill] sm:$0xff]  ;;  %v4670_v51 = vld [vmem:[#allocation22_spill] sm:$0xff] }
 0x1a2   :  { %4632 = vst [vmem:[#allocation50_spill] sm:$0xff] %v3842_v46  ;;  %4633 = vst [vmem:[#allocation51_spill] sm:$0xff] %v3844_v50  ;;  %v4664_v46 = vld [vmem:[#allocation34_spill] sm:$0xff]  ;;  %v4669_v50 = vld [vmem:[#allocation45_spill] sm:$0xff] }
 0x1a3   :  { %v560_v12 = vpop.f32.mrf.mxu1  ;;  %v2682_v49 = vpop.f32.mrf.mxu0 }
 0x1a4   :  { %v3846_v56 = vadd.f32 %v560_v12, %v300_v23  ;;  %v3848_v57 = vadd.f32 %v2682_v49, %v419_v61 }
 0x1a5   :  { %v562_v54 = vpop.f32.mrf.mxu1  ;;  %v655_v55 = vpop.f32.mrf.mxu0 }
 0x1a6   :  { %4634 = vst [vmem:[#allocation52_spill] sm:$0xff] %v3846_v56  ;;  %4635 = vst [vmem:[#allocation53_spill] sm:$0xff] %v3848_v57  ;;  %v3850_v18 = vadd.f32 %v562_v54, %v302_v62  ;;  %v3852_v53 = vadd.f32 %v2663_v3, %v655_v55  ;;  %v4666_v57 = vld [vmem:[#allocation44_spill] sm:$0xff] }
 0x1a7   :  { %v566_v52 = vpop.f32.mrf.mxu1 }
 0x1a8   :  { %4636 = vst [vmem:[#allocation54_spill] sm:$0xff] %v3850_v18  ;;  %4637 = vst [vmem:[#allocation55_spill] sm:$0xff] %v3852_v53  ;;  %v3854_v60 = vadd.f32 %v566_v52, %v294_v11  ;;  %v2685_v22 = vpop.f32.mrf.mxu0 }
 0x1a9   :  { %v3856_v48 = vadd.f32 %v2685_v22, %v409_v25  ;;  %v568_v59 = vpop.f32.mrf.mxu1 }
 0x1aa   :  { %4638 = vst [vmem:[#allocation56_spill] sm:$0xff] %v3854_v60  ;;  %v3858_v14 = vadd.f32 %v568_v59, %v296_v5  ;;  %v665_v21 = vpop.f32.mrf.mxu0 }
 0x1ab   :  { %4639 = vst [vmem:[#allocation57_spill] sm:$0xff] %v3856_v48  ;;  %v3860_v12 = vadd.f32 %v2660_v7, %v665_v21  ;;  %v572_v49 = vpop.f32.mrf.mxu1 }
 0x1ac   :  { %4640 = vst [vmem:[#allocation58_spill] sm:$0xff] %v3858_v14  ;;  %v3862_v61 = vadd.f32 %v572_v49, %v288_v4  ;;  %v2688_v23 = vpop.f32.mrf.mxu0 }
 0x1ad   :  { %4641 = vst [vmem:[#allocation59_spill] sm:$0xff] %v3860_v12  ;;  %v3864_v62 = vadd.f32 %v2688_v23, %v399_v13  ;;  %v574_v3 = vpop.f32.mrf.mxu1  ;;  %v4668_v12 = vld [vmem:[#allocation37_spill] sm:$0xff] }
 0x1ae   :  { %4642 = vst [vmem:[#allocation60_spill] sm:$0xff] %v3862_v61  ;;  %v3866_v54 = vadd.f32 %v574_v3, %v290_v15  ;;  %v675_v11 = vpop.f32.mrf.mxu0 }
 0x1af   :  { %4643 = vst [vmem:[#allocation61_spill] sm:$0xff] %v3864_v62  ;;  %v3868_v55 = vadd.f32 %v2657_v19, %v675_v11  ;;  %v578_v25 = vpop.f32.mrf.mxu1 }
 0x1b0   :  { %4644 = vst [vmem:[#allocation62_spill] sm:$0xff] %v3866_v54  ;;  %v3870_v52 = vadd.f32 %v578_v25, %v282_v31  ;;  %v2691_v5 = vpop.f32.mrf.mxu0 }
 0x1b1   :  { %4645 = vst [vmem:[#allocation63_spill] sm:$0xff] %v3868_v55  ;;  %v580_v22 = vpop.f32.mrf.mxu1 }
 0x1b2   :  { %v3872_v59 = vadd.f32 %v580_v22, %v284_v37  ;;  %v685_v7 = vpop.f32.mrf.mxu0 }
 0x1b3   :  { %v3875_v4 = vadd.f32 %v3830_v34, %v685_v7  ;;  %v584_v21 = vpop.f32.mrf.mxu1  ;;  %v3882_v34 = vld [vmem:[%s4529_s5] ss:$0 sm:$0xff] }
 0x1b4   :  { %v746_v49 = vadd.f32 %v584_v21, %v3826_v24 }
 0x1b5   :  { %v586_v13 = vpop.f32.mrf.mxu1 }
 0x1b6   :  { %v747_v11 = vadd.f32 %v586_v13, %v3828_v27  ;;  %v748_v27 = vadd.f32 %v2691_v5, %v3832_v40  ;;  %v4646_v40 = vmov 0.0   ;;  %v4648_v5 = vld [vmem:[#allocation38_spill] sm:$0xff] }
 0x1b7   :  { %v863_v15 = vpop.f32.mrf.mxu1 }
 0x1b8   :  { %v938_v23 = vadd.f32 %v863_v15, %v746_v49 }
 0x1b9   :  { %v865_v19 = vpop.f32.mrf.mxu1 }
 0x1ba   :  { %v2413_v3 = vmul.f32 -1.442695, %v938_v23  ;;  %v939_v31 = vadd.f32 %v865_v19, %v747_v11 }
 0x1bc   :  { %3063 = vpow2.f32 %v2413_v3  ;;  %v2414_v25 = vmul.f32 -1.442695, %v939_v31  ;;  %v3316_v31 = vmov 7  }
 0x1be   :  { %3065 = vpow2.f32 %v2414_v25  ;;  %v720_v25 = vsel %vm719_vm0, 0, %v3316_v31  ;;  %v4659_v31 = vld [vmem:[#allocation31_spill] sm:$0xff] }
 0x1bf   :  { %vm732_vm3 = vcmp.lt.s32.totalorder %v720_v25, %v3511_v16  ;;  %v4660_v25 = vld [vmem:[#allocation42_spill] sm:$0xff] }
 0x1c9   :  { %v3064_v37 = vpop.eup %3063 }
 0x1ca   :  { %v946_v22 = vadd.f32 1.0, %v3064_v37 }
 0x1cb   :  { %v3066_v53 = vpop.eup %3065 }
 0x1cc   :  { %3067 = vrcp.f32 %v946_v22  ;;  %v947_v21 = vadd.f32 1.0, %v3066_v53 }
 0x1ce   :  { %3069 = vrcp.f32 %v947_v21  ;;  %v4650_v21 = vld [vmem:[#allocation25_spill] sm:$0xff] }
 0x1d3   :  { %v934_v24 = vpop.f32.mrf.mxu0 }
 0x1d4   :  { %v958_v49 = vadd.f32 %v3882_v34, %v934_v24  ;;  %v4649_v24 = vld [vmem:[#allocation24_spill] sm:$0xff] }
 0x1d5   :  { %v2726_v7 = vpop.f32.mrf.mxu0 }
 0x1d9   :  { %v3068_v15 = vpop.eup %3067 }
 0x1da   :  { %v959_v13 = vmul.f32 %v3068_v15, %v958_v49  ;;  %v4651_v49 = vld [vmem:[#allocation39_spill] sm:$0xff]  ;;  %v4652_v15 = vld [vmem:[#allocation26_spill] sm:$0xff] }
 0x1db   :  { %v3070_v3 = vpop.eup %3069 }
 0x1dc   :  { %v960_v23 = vadd.f32 %v959_v13, %v748_v27  ;;  %v962_v19 = vsub.f32 1.0, %v3070_v3  ;;  %v964_v22 = vmul.f32 0.0, %v3070_v3  ;;  %v4653_v27 = vld [vmem:[#allocation27_spill] sm:$0xff]  ;;  %v4654_v13 = vld [vmem:[#allocation40_spill] sm:$0xff]  ;;  %v4656_v3 = vld [vmem:[#allocation29_spill] sm:$0xff] }
 0x1de   :  { %3071 = vtanh.f32 %v960_v23  ;;  %v4655_v23 = vld [vmem:[#allocation28_spill] sm:$0xff] }
 0x1eb   :  { %v3072_v11 = vpop.eup %3071 }
 0x1ec   :  { %v963_v37 = vmul.f32 %v3072_v11, %v962_v19  ;;  %v4657_v19 = vld [vmem:[#allocation41_spill] sm:$0xff]  ;;  %v4658_v11 = vld [vmem:[#allocation30_spill] sm:$0xff] }
 0x1ee   :  { %v965_v7 = vadd.f32 %v964_v22, %v963_v37  ;;  %v4661_v37 = vld [vmem:[#allocation32_spill] sm:$0xff]  ;;  %v4662_v22 = vld [vmem:[#allocation33_spill] sm:$0xff] }
 0x1f0   :  { %2416 = vmatmul.mubr.msk.f32.vlgmr.msra.gmra.mxu1 %vm732_vm3, %v965_v7  ;;  %2760 = vmatmul.mubr.msk.f32.vlgmr.msra.gmra.mxu0 %vm732_vm3, %v965_v7  ;;  %v3889_v53 = vsel %vm732_vm3, %v965_v7, 0.0  ;;  %v4663_v7 = vld [vmem:[#allocation43_spill] sm:$0xff] }
 0x1f1   :  { %1150 = vmatpush1.msra.mxu1 %v3547_v26  ;;  %2763 = vmatpush3.msra.mxu0 %v3669_v58 }
 0x1f2   :  { %1151 = vmatprep.subr.mxu1 %v3551_v28  ;;  %2764 = vmatprep.subr.mxu0 %v4646_v40 }
 0x1f3   :  { %1152 = vmatpush1.msra.mxu1 %v3556_v29  ;;  %2765 = vmatpush3.msra.mxu0 %v3689_v63 }
 0x1f4   :  { %1153 = vmatprep.subr.mxu1 %v3559_v30  ;;  %2766 = vmatprep.subr.mxu0 %v4646_v40 }
 0x1f5   :  { %1154 = vmatpush1.msra.mxu1 %v3565_v32  ;;  %2767 = vmatpush3.msra.mxu0 %v3695_v0 }
 0x1f6   :  { %1155 = vmatprep.subr.mxu1 %v3568_v33  ;;  %2768 = vmatprep.subr.mxu0 %v4646_v40 }
 0x1f7   :  { %1156 = vmatpush1.msra.mxu1 %v3574_v35  ;;  %2769 = vmatpush3.msra.mxu0 %v3701_v1 }
 0x1f8   :  { %1157 = vmatprep.subr.mxu1 %v3578_v36  ;;  %2770 = vmatprep.subr.mxu0 %v4646_v40 }
 0x1f9   :  { %1158 = vmatpush1.msra.mxu1 %v3583_v38  ;;  %2771 = vmatpush3.msra.mxu0 %v3707_v6 }
 0x1fa   :  { %1159 = vmatprep.subr.mxu1 %v3590_v39  ;;  %2772 = vmatprep.subr.mxu0 %v4646_v40 }
 0x1fb   :  { %1160 = vmatpush1.msra.mxu1 %v3593_v41  ;;  %2773 = vmatpush3.msra.mxu0 %v3713_v8 }
 0x1fc   :  { %1161 = vmatprep.subr.mxu1 %v3597_v43  ;;  %2774 = vmatprep.subr.mxu0 %v4646_v40 }
 0x1fd   :  { %1162 = vmatpush1.msra.mxu1 %v3602_v44  ;;  %2775 = vmatpush3.msra.mxu0 %v3719_v9 }
 0x1fe   :  { %1163 = vmatprep.subr.mxu1 %v3605_v45  ;;  %2776 = vmatprep.subr.mxu0 %v4646_v40 }
 0x1ff   :  { %1164 = vmatpush1.msra.mxu1 %v3611_v42  ;;  %2777 = vmatpush3.msra.mxu0 %v3725_v10 }
 0x200   :  { %1165 = vmatprep.subr.mxu1 %v3616_v47  ;;  %2778 = vmatprep.subr.mxu0 %v4646_v40 }
 0x201   :  { %1166 = vmatpush1.msra.mxu1 %v4647_v2  ;;  %2779 = vmatpush3.msra.mxu0 %v4648_v5 }
 0x202   :  { %1167 = vmatprep.subr.mxu1 %v4649_v24  ;;  %2780 = vmatprep.subr.mxu0 %v4646_v40 }
 0x203   :  { %1168 = vmatpush1.msra.mxu1 %v4650_v21  ;;  %2781 = vmatpush3.msra.mxu0 %v4651_v49 }
 0x204   :  { %1169 = vmatprep.subr.mxu1 %v4652_v15  ;;  %2782 = vmatprep.subr.mxu0 %v4646_v40 }
 0x205   :  { %1170 = vmatpush1.msra.mxu1 %v4653_v27  ;;  %2783 = vmatpush3.msra.mxu0 %v4654_v13 }
 0x206   :  { %1171 = vmatprep.subr.mxu1 %v4655_v23  ;;  %2784 = vmatprep.subr.mxu0 %v4646_v40 }
 0x207   :  { %1172 = vmatpush1.msra.mxu1 %v4656_v3  ;;  %2785 = vmatpush3.msra.mxu0 %v4657_v19 }
 0x208   :  { %1173 = vmatprep.subr.mxu1 %v4658_v11  ;;  %2786 = vmatprep.subr.mxu0 %v4646_v40 }
 0x209   :  { %1174 = vmatpush1.msra.mxu1 %v4659_v31  ;;  %2787 = vmatpush3.msra.mxu0 %v4660_v25 }
 0x20a   :  { %1175 = vmatprep.subr.mxu1 %v4661_v37  ;;  %2788 = vmatprep.subr.mxu0 %v4646_v40 }
 0x20b   :  { %1176 = vmatpush1.msra.mxu1 %v4662_v22  ;;  %2789 = vmatpush3.msra.mxu0 %v4663_v7 }
 0x20c   :  { %1177 = vmatprep.subr.mxu1 %v4664_v46  ;;  %2790 = vmatprep.subr.mxu0 %v4646_v40 }
 0x20d   :  { %1178 = vmatpush1.msra.mxu1 %v4665_v17  ;;  %2791 = vmatpush3.msra.mxu0 %v4666_v57 }
 0x20e   :  { %1179 = vmatprep.subr.mxu1 %v4667_v20  ;;  %2792 = vmatprep.subr.mxu0 %v4646_v40 }
 0x20f   :  { %1180 = vmatpush1.msra.mxu1 %v4668_v12  ;;  %1213 = vmatprep.mubr.f32.mxu1 %v4646_v40 }
 0x210   :  { %2793 = vmatpush3.msra.mxu0 %v4669_v50  ;;  %2794 = vmatprep.mubr.msk.f32.mxu0 %vm3315_vm1, %v4646_v40 }
 0x211   :  { %1322 = vmatprep.subr.mxu1 %v4670_v51  ;;  %2797 = vmatprep.subr.mxu0 %v4646_v40 }
 0x2b0   :  { %v1042_v48 = vpop.f32.mrf.mxu1  ;;  %v1113_v18 = vpop.f32.mrf.mxu0 }
 0x2b1   :  { %v1117_v56 = vadd.f32 %v1042_v48, %v3870_v52  ;;  %v1131_v51 = vadd.f32 %v3882_v34, %v1113_v18 }
 0x2b2   :  { %v1044_v55 = vpop.f32.mrf.mxu1  ;;  %v2761_v14 = vpop.f32.mrf.mxu0 }
 0x2b3   :  { %v2418_v60 = vmul.f32 -1.442695, %v1117_v56  ;;  %v1118_v62 = vadd.f32 %v1044_v55, %v3872_v59 }
 0x2b5   :  { %3073 = vpow2.f32 %v2418_v60  ;;  %v2419_v54 = vmul.f32 -1.442695, %v1118_v62 }
 0x2b7   :  { %3075 = vpow2.f32 %v2419_v54 }
 0x2c2   :  { %v3074_v61 = vpop.eup %3073 }
 0x2c3   :  { %v1125_v50 = vadd.f32 1.0, %v3074_v61 }
 0x2c4   :  { %v3076_v12 = vpop.eup %3075 }
 0x2c5   :  { %3077 = vrcp.f32 %v1125_v50  ;;  %v1126_v20 = vadd.f32 1.0, %v3076_v12  ;;  %v4680_v12 = vld [vmem:[#allocation62_spill] sm:$0xff] }
 0x2c7   :  { %3079 = vrcp.f32 %v1126_v20 }
 0x2d2   :  { %v3078_v57 = vpop.eup %3077 }
 0x2d3   :  { %v1132_v17 = vmul.f32 %v3078_v57, %v1131_v51  ;;  %v4679_v51 = vld [vmem:[#allocation60_spill] sm:$0xff] }
 0x2d4   :  { %v3080_v46 = vpop.eup %3079 }
 0x2d5   :  { %v1133_v48 = vadd.f32 %v1132_v17, %v3875_v4  ;;  %v1137_v56 = vmul.f32 %v3080_v46, %v3889_v53  ;;  %v1135_v14 = vsub.f32 1.0, %v3080_v46 }
 0x2d7   :  { %3081 = vtanh.f32 %v1133_v48 }
 0x2e4   :  { %v3082_v60 = vpop.eup %3081 }
 0x2e5   :  { %v1136_v62 = vmul.f32 %v3082_v60, %v1135_v14 }
 0x2e7   :  { %v1138_v54 = vadd.f32 %v1137_v56, %v1136_v62  ;;  %v4681_v62 = vld [vmem:[#allocation61_spill] sm:$0xff] }
 0x2e9   :  { %v3967_v50 = vsel %vm733_vm10, %v1138_v54, %v3889_v53 }
 0x2ea   :  { %1214 = vmatmul.mubr.f32.vlgmr.msra.gmra.mxu1 %v3967_v50  ;;  %2795 = vmatmul.mubr.f32.vlgmr.msra.gmra.mxu0 %v3967_v50 }
 0x2eb   :  { %1323 = vmatpush1.msra.mxu1 %v3547_v26  ;;  %2798 = vmatpush3.msra.mxu0 %v3669_v58  ;;  %v4672_v26 = vld [vmem:[#allocation34_spill] sm:$0xff] }
 0x2ec   :  { %1324 = vmatprep.subr.mxu1 %v3551_v28  ;;  %2799 = vmatprep.subr.mxu0 %v4646_v40  ;;  %v4673_v28 = vld [vmem:[#allocation35_spill] sm:$0xff] }
 0x2ed   :  { %1325 = vmatpush1.msra.mxu1 %v3556_v29  ;;  %2800 = vmatpush3.msra.mxu0 %v3689_v63  ;;  %v4674_v29 = vld [vmem:[#allocation44_spill] sm:$0xff] }
 0x2ee   :  { %1326 = vmatprep.subr.mxu1 %v3559_v30  ;;  %2801 = vmatprep.subr.mxu0 %v4646_v40  ;;  %v4675_v30 = vld [vmem:[#allocation36_spill] sm:$0xff] }
 0x2ef   :  { %1327 = vmatpush1.msra.mxu1 %v3565_v32  ;;  %2802 = vmatpush3.msra.mxu0 %v3695_v0  ;;  %v4676_v32 = vld [vmem:[#allocation37_spill] sm:$0xff] }
 0x2f0   :  { %1328 = vmatprep.subr.mxu1 %v3568_v33  ;;  %2803 = vmatprep.subr.mxu0 %v4646_v40  ;;  %v4677_v33 = vld [vmem:[#allocation45_spill] sm:$0xff] }
 0x2f1   :  { %1329 = vmatpush1.msra.mxu1 %v3574_v35  ;;  %2804 = vmatpush3.msra.mxu0 %v3701_v1  ;;  %v4678_v35 = vld [vmem:[#allocation22_spill] sm:$0xff] }
 0x2f2   :  { %1330 = vmatprep.subr.mxu1 %v3578_v36  ;;  %2805 = vmatprep.subr.mxu0 %v4646_v40 }
 0x2f3   :  { %1331 = vmatpush1.msra.mxu1 %v3583_v38  ;;  %2806 = vmatpush3.msra.mxu0 %v3707_v6 }
 0x2f4   :  { %1332 = vmatprep.subr.mxu1 %v3590_v39  ;;  %2807 = vmatprep.subr.mxu0 %v4646_v40 }
 0x2f5   :  { %1333 = vmatpush1.msra.mxu1 %v3593_v41  ;;  %2808 = vmatpush3.msra.mxu0 %v3713_v8 }
 0x2f6   :  { %1334 = vmatprep.subr.mxu1 %v3597_v43  ;;  %2809 = vmatprep.subr.mxu0 %v4646_v40 }
 0x2f7   :  { %1335 = vmatpush1.msra.mxu1 %v3602_v44  ;;  %2810 = vmatpush3.msra.mxu0 %v3719_v9 }
 0x2f8   :  { %1336 = vmatprep.subr.mxu1 %v3605_v45  ;;  %2811 = vmatprep.subr.mxu0 %v4646_v40 }
 0x2f9   :  { %1337 = vmatpush1.msra.mxu1 %v3611_v42  ;;  %2812 = vmatpush3.msra.mxu0 %v3725_v10 }
 0x2fa   :  { %1338 = vmatprep.subr.mxu1 %v3616_v47  ;;  %2813 = vmatprep.subr.mxu0 %v4646_v40 }
 0x2fb   :  { %1339 = vmatpush1.msra.mxu1 %v4647_v2  ;;  %2814 = vmatpush3.msra.mxu0 %v4648_v5 }
 0x2fc   :  { %1340 = vmatprep.subr.mxu1 %v4649_v24  ;;  %2815 = vmatprep.subr.mxu0 %v4646_v40 }
 0x2fd   :  { %1341 = vmatpush1.msra.mxu1 %v4650_v21  ;;  %2816 = vmatpush3.msra.mxu0 %v4651_v49 }
 0x2fe   :  { %1342 = vmatprep.subr.mxu1 %v4652_v15  ;;  %2817 = vmatprep.subr.mxu0 %v4646_v40 }
 0x2ff   :  { %1343 = vmatpush1.msra.mxu1 %v4653_v27  ;;  %2818 = vmatpush3.msra.mxu0 %v4654_v13 }
 0x300   :  { %1344 = vmatprep.subr.mxu1 %v4655_v23  ;;  %2819 = vmatprep.subr.mxu0 %v4646_v40 }
 0x301   :  { %1345 = vmatpush1.msra.mxu1 %v4656_v3  ;;  %2820 = vmatpush3.msra.mxu0 %v4657_v19 }
 0x302   :  { %1346 = vmatprep.subr.mxu1 %v4658_v11  ;;  %2821 = vmatprep.subr.mxu0 %v4646_v40 }
 0x303   :  { %1347 = vmatpush1.msra.mxu1 %v4659_v31  ;;  %2822 = vmatpush3.msra.mxu0 %v4660_v25 }
 0x304   :  { %1348 = vmatprep.subr.mxu1 %v4661_v37  ;;  %2823 = vmatprep.subr.mxu0 %v4646_v40 }
 0x305   :  { %1349 = vmatpush1.msra.mxu1 %v4662_v22  ;;  %2824 = vmatpush3.msra.mxu0 %v4663_v7 }
 0x306   :  { %1350 = vmatprep.subr.mxu1 %v4672_v26  ;;  %2825 = vmatprep.subr.mxu0 %v4646_v40 }
 0x307   :  { %1351 = vmatpush1.msra.mxu1 %v4673_v28  ;;  %2826 = vmatpush3.msra.mxu0 %v4674_v29 }
 0x308   :  { %1352 = vmatprep.subr.mxu1 %v4675_v30  ;;  %2827 = vmatprep.subr.mxu0 %v4646_v40 }
 0x309   :  { %1353 = vmatpush1.msra.mxu1 %v4676_v32  ;;  %1386 = vmatprep.mubr.f32.mxu1 %v4646_v40 }
 0x30a   :  { %2828 = vmatpush3.msra.mxu0 %v4677_v33  ;;  %2829 = vmatprep.mubr.msk.f32.mxu0 %vm3315_vm1, %v4646_v40 }
 0x30b   :  { %1495 = vmatprep.subr.mxu1 %v4678_v35  ;;  %2832 = vmatprep.subr.mxu0 %v4646_v40 }
 0x3aa   :  { %v1215_v36 = vpop.f32.mrf.mxu1  ;;  %v1286_v46 = vpop.f32.mrf.mxu0 }
 0x3ab   :  { %v1290_v17 = vadd.f32 %v1215_v36, %v4679_v51  ;;  %v1304_v56 = vadd.f32 %v3882_v34, %v1286_v46  ;;  %v4051_v46 = vld [vmem:[#allocation8 + $0x168] sm:$0xff] }
 0x3ac   :  { %v2796_v18 = vpop.f32.mrf.mxu0  ;;  %v1217_v57 = vpop.f32.mrf.mxu1 }
 0x3ad   :  { %v2420_v20 = vmul.f32 -1.442695, %v1290_v17  ;;  %v1291_v55 = vadd.f32 %v1217_v57, %v4680_v12  ;;  %v4055_v12 = vld [vmem:[#allocation8 + $0x158] sm:$0xff] }
 0x3af   :  { %3083 = vpow2.f32 %v2420_v20  ;;  %v2421_v52 = vmul.f32 -1.442695, %v1291_v55  ;;  %v4059_v55 = vld [vmem:[#allocation8 + $0x150] sm:$0xff]  ;;  %v4216_v20 = vld [vmem:[#allocation8 + $0xb8] sm:$0xff] }
 0x3b1   :  { %3085 = vpow2.f32 %v2421_v52  ;;  %v4067_v52 = vld [vmem:[#allocation8 + $0x138] sm:$0xff] }
 0x3bc   :  { %v3084_v59 = vpop.eup %3083 }
 0x3bd   :  { %v1298_v4 = vadd.f32 1.0, %v3084_v59  ;;  %v4075_v59 = vld [vmem:[#allocation8 + $0x120] sm:$0xff] }
 0x3be   :  { %v3086_v53 = vpop.eup %3085 }
 0x3bf   :  { %3087 = vrcp.f32 %v1298_v4  ;;  %v1299_v48 = vadd.f32 1.0, %v3086_v53  ;;  %v4168_v4 = vld [vmem:[#allocation8 + $0x130] sm:$0xff]  ;;  %v4173_v53 = vld [vmem:[#allocation8 + $0x108] sm:$0xff] }
 0x3c1   :  { %3089 = vrcp.f32 %v1299_v48  ;;  %v4176_v48 = vld [vmem:[#allocation8 + $0x118] sm:$0xff] }
 0x3cc   :  { %v3088_v14 = vpop.eup %3087 }
 0x3cd   :  { %v1305_v60 = vmul.f32 %v3088_v14, %v1304_v56  ;;  %v4179_v56 = vld [vmem:[#allocation8 + $0xf8] sm:$0xff]  ;;  %v4183_v14 = vld [vmem:[#allocation8 + $0xf0] sm:$0xff] }
 0x3ce   :  { %v3090_v61 = vpop.eup %3089 }
 0x3cf   :  { %v1306_v54 = vadd.f32 %v1305_v60, %v4681_v62  ;;  %v1308_v35 = vsub.f32 1.0, %v3090_v61  ;;  %v1310_v17 = vmul.f32 %v3090_v61, %v3967_v50  ;;  %v4186_v60 = vld [vmem:[#allocation8 + $0x100] sm:$0xff]  ;;  %v4196_v61 = vld [vmem:[#allocation8 + $0xe8] sm:$0xff] }
 0x3d0   :  { %v4189_v62 = vld [vmem:[#allocation8 + $0xe0] sm:$0xff] }
 0x3d1   :  { %3091 = vtanh.f32 %v1306_v54  ;;  %v4193_v54 = vld [vmem:[#allocation8 + $0xd8] sm:$0xff] }
 0x3de   :  { %v3092_v36 = vpop.eup %3091 }
 0x3df   :  { %v1309_v51 = vmul.f32 %v3092_v36, %v1308_v35  ;;  %v4199_v35 = vld [vmem:[#allocation8 + $0xc8] sm:$0xff]  ;;  %v4203_v36 = vld [vmem:[#allocation8 + $0xc0] sm:$0xff] }
 0x3e1   :  { %v1311_v18 = vadd.f32 %v1310_v17, %v1309_v51  ;;  %v4206_v51 = vld [vmem:[#allocation8 + $0xd0] sm:$0xff] }
 0x3e2   :  { %v4209_v17 = vld [vmem:[#allocation8 + $0xb0] sm:$0xff] }
 0x3e3   :  { %v4047_v57 = vsel %vm734_vm11, %v1311_v18, %v3967_v50  ;;  %v4063_v50 = vld [vmem:[#allocation8 + $0x140] sm:$0xff]  ;;  %v4213_v18 = vld [vmem:[#allocation8 + $0xa8] sm:$0xff] }
 0x3e4   :  { %1387 = vmatmul.mubr.f32.vlgmr.msra.gmra.mxu1 %v4047_v57  ;;  %2830 = vmatmul.mubr.f32.vlgmr.msra.gmra.mxu0 %v4047_v57 }
 0x3e5   :  { %1496 = vmatpush1.msra.mxu1 %v4051_v46  ;;  %2833 = vmatpush3.msra.mxu0 %v3669_v58  ;;  %v4071_v58 = vld [vmem:[#allocation8 + $0x128] sm:$0xff] }
 0x3e6   :  { %1497 = vmatprep.subr.mxu1 %v4055_v12  ;;  %2834 = vmatprep.subr.mxu0 %v4646_v40 }
 0x3e7   :  { %1498 = vmatpush1.msra.mxu1 %v4059_v55  ;;  %2835 = vmatpush3.msra.mxu0 %v3689_v63  ;;  %v4079_v63 = vld [vmem:[#allocation8 + $0x110] sm:$0xff] }
 0x3e8   :  { %1499 = vmatprep.subr.mxu1 %v4063_v50  ;;  %2836 = vmatprep.subr.mxu0 %v4646_v40 }
 0x3e9   :  { %1500 = vmatpush1.msra.mxu1 %v4067_v52  ;;  %2837 = vmatpush3.msra.mxu0 %v3695_v0  ;;  %v4684_v0 = vld [vmem:[#allocation58_spill] sm:$0xff] }
 0x3ea   :  { %1501 = vmatprep.subr.mxu1 %v4071_v58  ;;  %2838 = vmatprep.subr.mxu0 %v4646_v40 }
 0x3eb   :  { %1502 = vmatpush1.msra.mxu1 %v4075_v59  ;;  %2839 = vmatpush3.msra.mxu0 %v3701_v1 }
 0x3ec   :  { %1503 = vmatprep.subr.mxu1 %v4079_v63  ;;  %2840 = vmatprep.subr.mxu0 %v4646_v40 }
 0x3ed   :  { %1504 = vmatpush1.msra.mxu1 %v3583_v38  ;;  %2841 = vmatpush3.msra.mxu0 %v3707_v6  ;;  %v4132_v38 = vld [vmem:[#allocation8 + $0x170] sm:$0xff] }
 0x3ee   :  { %1505 = vmatprep.subr.mxu1 %v3590_v39  ;;  %2842 = vmatprep.subr.mxu0 %v4646_v40 }
 0x3ef   :  { %1506 = vmatpush1.msra.mxu1 %v3593_v41  ;;  %2843 = vmatpush3.msra.mxu0 %v3713_v8 }
 0x3f0   :  { %1507 = vmatprep.subr.mxu1 %v3597_v43  ;;  %2844 = vmatprep.subr.mxu0 %v4646_v40  ;;  %v4683_v43 = vld [vmem:[#allocation56_spill] sm:$0xff] }
 0x3f1   :  { %1508 = vmatpush1.msra.mxu1 %v3602_v44  ;;  %2845 = vmatpush3.msra.mxu0 %v3719_v9 }
 0x3f2   :  { %1509 = vmatprep.subr.mxu1 %v3605_v45  ;;  %2846 = vmatprep.subr.mxu0 %v4646_v40 }
 0x3f3   :  { %1510 = vmatpush1.msra.mxu1 %v3611_v42  ;;  %2847 = vmatpush3.msra.mxu0 %v3725_v10 }
 0x3f4   :  { %1511 = vmatprep.subr.mxu1 %v3616_v47  ;;  %2848 = vmatprep.subr.mxu0 %v4646_v40 }
 0x3f5   :  { %1512 = vmatpush1.msra.mxu1 %v4647_v2  ;;  %2849 = vmatpush3.msra.mxu0 %v4648_v5 }
 0x3f6   :  { %1513 = vmatprep.subr.mxu1 %v4649_v24  ;;  %2850 = vmatprep.subr.mxu0 %v4646_v40 }
 0x3f7   :  { %1514 = vmatpush1.msra.mxu1 %v4650_v21  ;;  %2851 = vmatpush3.msra.mxu0 %v4651_v49  ;;  %v4685_v49 = vld [vmem:[#allocation63_spill] sm:$0xff] }
 0x3f8   :  { %1515 = vmatprep.subr.mxu1 %v4652_v15  ;;  %2852 = vmatprep.subr.mxu0 %v4646_v40 }
 0x3f9   :  { %1516 = vmatpush1.msra.mxu1 %v4653_v27  ;;  %2853 = vmatpush3.msra.mxu0 %v4654_v13 }
 0x3fa   :  { %1517 = vmatprep.subr.mxu1 %v4655_v23  ;;  %2854 = vmatprep.subr.mxu0 %v4646_v40 }
 0x3fb   :  { %1518 = vmatpush1.msra.mxu1 %v4656_v3  ;;  %2855 = vmatpush3.msra.mxu0 %v4657_v19 }
 0x3fc   :  { %1519 = vmatprep.subr.mxu1 %v4658_v11  ;;  %2856 = vmatprep.subr.mxu0 %v4646_v40 }
 0x3fd   :  { %1520 = vmatpush1.msra.mxu1 %v4659_v31  ;;  %2857 = vmatpush3.msra.mxu0 %v4660_v25 }
 0x3fe   :  { %1521 = vmatprep.subr.mxu1 %v4661_v37  ;;  %2858 = vmatprep.subr.mxu0 %v4646_v40 }
 0x3ff   :  { %1522 = vmatpush1.msra.mxu1 %v4662_v22  ;;  %2859 = vmatpush3.msra.mxu0 %v4663_v7  ;;  %v4692_v22 = vld [vmem:[#allocation57_spill] sm:$0xff] }
 0x400   :  { %1523 = vmatprep.subr.mxu1 %v4672_v26  ;;  %2860 = vmatprep.subr.mxu0 %v4646_v40 }
 0x401   :  { %1524 = vmatpush1.msra.mxu1 %v4673_v28  ;;  %2861 = vmatpush3.msra.mxu0 %v4674_v29  ;;  %v4150_v28 = vld [vmem:[#allocation8 + $0x178] sm:$0xff] }
 0x402   :  { %1525 = vmatprep.subr.mxu1 %v4675_v30  ;;  %2862 = vmatprep.subr.mxu0 %v4646_v40  ;;  %v4156_v30 = vld [vmem:[#allocation8 + $0x160] sm:$0xff] }
 0x403   :  { %1526 = vmatpush1.msra.mxu1 %v4676_v32  ;;  %1559 = vmatprep.mubr.f32.mxu1 %v4646_v40  ;;  %v4162_v32 = vld [vmem:[#allocation8 + $0x148] sm:$0xff] }
 0x404   :  { %2863 = vmatpush3.msra.mxu0 %v4677_v33  ;;  %2864 = vmatprep.mubr.msk.f32.mxu0 %vm3315_vm1, %v4646_v40 }
 0x405   :  { %1668 = vmatprep.subr.mxu1 %v4132_v38  ;;  %2867 = vmatprep.subr.mxu0 %v4646_v40 }
 0x4a4   :  { %v1388_v39 = vpop.f32.mrf.mxu1  ;;  %v1459_v41 = vpop.f32.mrf.mxu0 }
 0x4a5   :  { %v1463_v44 = vadd.f32 %v1388_v39, %v4683_v43  ;;  %v1477_v5 = vadd.f32 %v3882_v34, %v1459_v41  ;;  %v4223_v39 = vld [vmem:[#allocation8 + $0x90] sm:$0xff]  ;;  %v4226_v41 = vld [vmem:[#allocation8 + $0xa0] sm:$0xff] }
 0x4a6   :  { %v2831_v45 = vpop.f32.mrf.mxu0  ;;  %v1390_v47 = vpop.f32.mrf.mxu1  ;;  %v4229_v43 = vld [vmem:[#allocation8 + $0x80] sm:$0xff] }
 0x4a7   :  { %v2422_v42 = vmul.f32 -1.442695, %v1463_v44  ;;  %v1464_v1 = vadd.f32 %v1390_v47, %v4684_v0  ;;  %v4233_v44 = vld [vmem:[#allocation8 + $0x78] sm:$0xff]  ;;  %v4237_v45 = vld [vmem:[#allocation8 + $0x68] sm:$0xff]  ;;  %v4245_v47 = vld [vmem:[#allocation8 + $0x50] sm:$0xff] }
 0x4a8   :  { %v4249_v0 = vld [vmem:[#allocation8 + $0x48] sm:$0xff] }
 0x4a9   :  { %3093 = vpow2.f32 %v2422_v42  ;;  %v2423_v6 = vmul.f32 -1.442695, %v1464_v1  ;;  %v4241_v42 = vld [vmem:[#allocation8 + $0x60] sm:$0xff]  ;;  %v4257_v1 = vld [vmem:[#allocation8 + $0x30] sm:$0xff] }
 0x4ab   :  { %3095 = vpow2.f32 %v2423_v6  ;;  %v4265_v6 = vld [vmem:[#allocation8 + $0x18] sm:$0xff] }
 0x4ac   :  { %4687 = vst [vmem:[#allocation23_spill] sm:$0xff] %v4265_v6 }
 0x4b6   :  { %v3094_v8 = vpop.eup %3093 }
 0x4b7   :  { %v1471_v9 = vadd.f32 1.0, %v3094_v8  ;;  %v4273_v8 = vld [vmem:[#allocation8] sm:$0xff] }
 0x4b8   :  { %v3096_v10 = vpop.eup %3095  ;;  %4689 = vst [vmem:[#allocation24_spill] sm:$0xff] %v4273_v8 }
 0x4b9   :  { %3097 = vrcp.f32 %v1471_v9  ;;  %v1472_v2 = vadd.f32 1.0, %v3096_v10  ;;  %v4690_v9 = vld [vmem:[#allocation52_spill] sm:$0xff] }
 0x4bb   :  { %3099 = vrcp.f32 %v1472_v2 }
 0x4c6   :  { %v3098_v24 = vpop.eup %3097 }
 0x4c7   :  { %v1478_v21 = vmul.f32 %v3098_v24, %v1477_v5 }
 0x4c8   :  { %v3100_v27 = vpop.eup %3099 }
 0x4c9   :  { %v1479_v15 = vadd.f32 %v1478_v21, %v4685_v49  ;;  %v1481_v23 = vsub.f32 1.0, %v3100_v27  ;;  %v1483_v31 = vmul.f32 %v3100_v27, %v4047_v57  ;;  %v4691_v21 = vld [vmem:[#allocation54_spill] sm:$0xff] }
 0x4cb   :  { %3101 = vtanh.f32 %v1479_v15 }
 0x4d8   :  { %v3102_v3 = vpop.eup %3101 }
 0x4d9   :  { %v1482_v11 = vmul.f32 %v3102_v3, %v1481_v23 }
 0x4db   :  { %v1484_v37 = vadd.f32 %v1483_v31, %v1482_v11 }
 0x4dd   :  { %v4145_v26 = vsel %vm735_vm12, %v1484_v37, %v4047_v57  ;;  %v4219_v57 = vld [vmem:[#allocation8 + $0x98] sm:$0xff] }
 0x4de   :  { %1560 = vmatmul.mubr.f32.vlgmr.msra.gmra.mxu1 %v4145_v26  ;;  %2865 = vmatmul.mubr.f32.vlgmr.msra.gmra.mxu0 %v4145_v26 }
 0x4df   :  { %1669 = vmatpush1.msra.mxu1 %v4051_v46  ;;  %2868 = vmatpush3.msra.mxu0 %v4150_v28 }
 0x4e0   :  { %1670 = vmatprep.subr.mxu1 %v4055_v12  ;;  %2869 = vmatprep.subr.mxu0 %v4646_v40 }
 0x4e1   :  { %1671 = vmatpush1.msra.mxu1 %v4059_v55  ;;  %2870 = vmatpush3.msra.mxu0 %v4156_v30 }
 0x4e2   :  { %1672 = vmatprep.subr.mxu1 %v4063_v50  ;;  %2871 = vmatprep.subr.mxu0 %v4646_v40 }
 0x4e3   :  { %1673 = vmatpush1.msra.mxu1 %v4067_v52  ;;  %2872 = vmatpush3.msra.mxu0 %v4162_v32 }
 0x4e4   :  { %1674 = vmatprep.subr.mxu1 %v4071_v58  ;;  %2873 = vmatprep.subr.mxu0 %v4646_v40 }
 0x4e5   :  { %1675 = vmatpush1.msra.mxu1 %v4075_v59  ;;  %2874 = vmatpush3.msra.mxu0 %v4168_v4 }
 0x4e6   :  { %1676 = vmatprep.subr.mxu1 %v4079_v63  ;;  %2875 = vmatprep.subr.mxu0 %v4646_v40 }
 0x4e7   :  { %1677 = vmatpush1.msra.mxu1 %v4173_v53  ;;  %2876 = vmatpush3.msra.mxu0 %v4176_v48 }
 0x4e8   :  { %1678 = vmatprep.subr.mxu1 %v4179_v56  ;;  %2877 = vmatprep.subr.mxu0 %v4646_v40 }
 0x4e9   :  { %1679 = vmatpush1.msra.mxu1 %v4183_v14  ;;  %2878 = vmatpush3.msra.mxu0 %v4186_v60 }
 0x4ea   :  { %1680 = vmatprep.subr.mxu1 %v4189_v62  ;;  %2879 = vmatprep.subr.mxu0 %v4646_v40 }
 0x4eb   :  { %1681 = vmatpush1.msra.mxu1 %v4193_v54  ;;  %2880 = vmatpush3.msra.mxu0 %v4196_v61 }
 0x4ec   :  { %1682 = vmatprep.subr.mxu1 %v4199_v35  ;;  %2881 = vmatprep.subr.mxu0 %v4646_v40 }
 0x4ed   :  { %1683 = vmatpush1.msra.mxu1 %v4203_v36  ;;  %2882 = vmatpush3.msra.mxu0 %v4206_v51 }
 0x4ee   :  { %1684 = vmatprep.subr.mxu1 %v4209_v17  ;;  %2883 = vmatprep.subr.mxu0 %v4646_v40 }
 0x4ef   :  { %1685 = vmatpush1.msra.mxu1 %v4213_v18  ;;  %2884 = vmatpush3.msra.mxu0 %v4216_v20 }
 0x4f0   :  { %1686 = vmatprep.subr.mxu1 %v4219_v57  ;;  %2885 = vmatprep.subr.mxu0 %v4646_v40 }
 0x4f1   :  { %1687 = vmatpush1.msra.mxu1 %v4223_v39  ;;  %2886 = vmatpush3.msra.mxu0 %v4226_v41 }
 0x4f2   :  { %1688 = vmatprep.subr.mxu1 %v4229_v43  ;;  %2887 = vmatprep.subr.mxu0 %v4646_v40 }
 0x4f3   :  { %1689 = vmatpush1.msra.mxu1 %v4233_v44  ;;  %2888 = vmatpush3.msra.mxu0 %v4654_v13  ;;  %v4253_v13 = vld [vmem:[#allocation8 + $0x38] sm:$0xff] }
 0x4f4   :  { %1690 = vmatprep.subr.mxu1 %v4237_v45  ;;  %2889 = vmatprep.subr.mxu0 %v4646_v40 }
 0x4f5   :  { %1691 = vmatpush1.msra.mxu1 %v4241_v42  ;;  %2890 = vmatpush3.msra.mxu0 %v4657_v19  ;;  %v4261_v19 = vld [vmem:[#allocation8 + $0x20] sm:$0xff] }
 0x4f6   :  { %1692 = vmatprep.subr.mxu1 %v4245_v47  ;;  %2891 = vmatprep.subr.mxu0 %v4646_v40 }
 0x4f7   :  { %1693 = vmatpush1.msra.mxu1 %v4249_v0  ;;  %2892 = vmatpush3.msra.mxu0 %v4660_v25  ;;  %v4269_v25 = vld [vmem:[#allocation8 + $0x8] sm:$0xff] }
 0x4f8   :  { %1694 = vmatprep.subr.mxu1 %v4253_v13  ;;  %2893 = vmatprep.subr.mxu0 %v4646_v40  ;;  %4688 = vst [vmem:[#allocation38_spill] sm:$0xff] %v4269_v25 }
 0x4f9   :  { %1695 = vmatpush1.msra.mxu1 %v4257_v1  ;;  %2894 = vmatpush3.msra.mxu0 %v4663_v7 }
 0x4fa   :  { %1696 = vmatprep.subr.mxu1 %v4261_v19  ;;  %2895 = vmatprep.subr.mxu0 %v4646_v40 }
 0x4fb   :  { %1697 = vmatpush1.msra.mxu1 %v4265_v6  ;;  %2896 = vmatpush3.msra.mxu0 %v4674_v29 }
 0x4fc   :  { %1698 = vmatprep.subr.mxu1 %v4269_v25  ;;  %2897 = vmatprep.subr.mxu0 %v4646_v40 }
 0x4fd   :  { %1699 = vmatpush1.msra.mxu1 %v4273_v8  ;;  %1732 = vmatprep.mubr.f32.mxu1 %v4646_v40 }
 0x4fe   :  { %2898 = vmatpush3.msra.mxu0 %v4677_v33  ;;  %2899 = vmatprep.mubr.msk.f32.mxu0 %vm3315_vm1, %v4646_v40 }
 0x4ff   :  { %1841 = vmatprep.subr.mxu1 %v4132_v38  ;;  %2902 = vmatprep.subr.mxu0 %v4646_v40 }
 0x59e   :  { %v1561_v7 = vpop.f32.mrf.mxu1  ;;  %v1632_v29 = vpop.f32.mrf.mxu0 }
 0x59f   :  { %v1636_v10 = vadd.f32 %v1561_v7, %v4690_v9  ;;  %v1650_v11 = vadd.f32 %v3882_v34, %v1632_v29  ;;  %v4342_v29 = vld [vmem:[#allocation8 + $0x70] sm:$0xff] }
 0x5a0   :  { %v2866_v2 = vpop.f32.mrf.mxu0  ;;  %v1563_v24 = vpop.f32.mrf.mxu1 }
 0x5a1   :  { %v2424_v5 = vmul.f32 -1.442695, %v1636_v10  ;;  %v1637_v49 = vadd.f32 %v1563_v24, %v4691_v21 }
 0x5a3   :  { %3103 = vpow2.f32 %v2424_v5  ;;  %v2425_v15 = vmul.f32 -1.442695, %v1637_v49 }
 0x5a5   :  { %3105 = vpow2.f32 %v2425_v15 }
 0x5b0   :  { %v3104_v33 = vpop.eup %3103 }
 0x5b1   :  { %v1644_v27 = vadd.f32 1.0, %v3104_v33  ;;  %v4348_v33 = vld [vmem:[#allocation8 + $0x58] sm:$0xff] }
 0x5b2   :  { %v3106_v23 = vpop.eup %3105 }
 0x5b3   :  { %3107 = vrcp.f32 %v1644_v27  ;;  %v1645_v3 = vadd.f32 1.0, %v3106_v23  ;;  %v4354_v27 = vld [vmem:[#allocation8 + $0x40] sm:$0xff]  ;;  %v4360_v23 = vld [vmem:[#allocation8 + $0x28] sm:$0xff] }
 0x5b4   :  { %4694 = vst [vmem:[#allocation25_spill] sm:$0xff] %v4360_v23 }
 0x5b5   :  { %3109 = vrcp.f32 %v1645_v3  ;;  %v4367_v3 = vld [vmem:[#allocation8 + $0x10] sm:$0xff] }
 0x5b6   :  { %4695 = vst [vmem:[#allocation39_spill] sm:$0xff] %v4367_v3 }
 0x5c0   :  { %v3108_v31 = vpop.eup %3107 }
 0x5c1   :  { %v1651_v37 = vmul.f32 %v3108_v31, %v1650_v11 }
 0x5c2   :  { %v3110_v9 = vpop.eup %3109 }
 0x5c3   :  { %v1652_v7 = vadd.f32 %v1651_v37, %v4692_v22  ;;  %v1654_v10 = vsub.f32 1.0, %v3110_v9  ;;  %v1656_v24 = vmul.f32 %v3110_v9, %v4145_v26  ;;  %v4696_v37 = vld [vmem:[#allocation49_spill] sm:$0xff] }
 0x5c5   :  { %3111 = vtanh.f32 %v1652_v7 }
 0x5d2   :  { %v3112_v2 = vpop.eup %3111 }
 0x5d3   :  { %v1655_v5 = vmul.f32 %v3112_v2, %v1654_v10  ;;  %v4697_v2 = vld [vmem:[#allocation51_spill] sm:$0xff] }
 0x5d5   :  { %v1657_v21 = vadd.f32 %v1656_v24, %v1655_v5 }
 0x5d7   :  { %v4291_v15 = vsel %vm736_vm13, %v1657_v21, %v4145_v26  ;;  %v4336_v26 = vld [vmem:[#allocation8 + $0x88] sm:$0xff] }
 0x5d8   :  { %1733 = vmatmul.mubr.f32.vlgmr.msra.gmra.mxu1 %v4291_v15  ;;  %2900 = vmatmul.mubr.f32.vlgmr.msra.gmra.mxu0 %v4291_v15 }
 0x5d9   :  { %1842 = vmatpush1.msra.mxu1 %v4051_v46  ;;  %2903 = vmatpush3.msra.mxu0 %v4150_v28 }
 0x5da   :  { %1843 = vmatprep.subr.mxu1 %v4055_v12  ;;  %2904 = vmatprep.subr.mxu0 %v4646_v40 }
 0x5db   :  { %1844 = vmatpush1.msra.mxu1 %v4059_v55  ;;  %2905 = vmatpush3.msra.mxu0 %v4156_v30 }
 0x5dc   :  { %1845 = vmatprep.subr.mxu1 %v4063_v50  ;;  %2906 = vmatprep.subr.mxu0 %v4646_v40 }
 0x5dd   :  { %1846 = vmatpush1.msra.mxu1 %v4067_v52  ;;  %2907 = vmatpush3.msra.mxu0 %v4162_v32 }
 0x5de   :  { %1847 = vmatprep.subr.mxu1 %v4071_v58  ;;  %2908 = vmatprep.subr.mxu0 %v4646_v40 }
 0x5df   :  { %1848 = vmatpush1.msra.mxu1 %v4075_v59  ;;  %2909 = vmatpush3.msra.mxu0 %v4168_v4 }
 0x5e0   :  { %1849 = vmatprep.subr.mxu1 %v4079_v63  ;;  %2910 = vmatprep.subr.mxu0 %v4646_v40 }
 0x5e1   :  { %1850 = vmatpush1.msra.mxu1 %v4173_v53  ;;  %2911 = vmatpush3.msra.mxu0 %v4176_v48 }
 0x5e2   :  { %1851 = vmatprep.subr.mxu1 %v4179_v56  ;;  %2912 = vmatprep.subr.mxu0 %v4646_v40 }
 0x5e3   :  { %1852 = vmatpush1.msra.mxu1 %v4183_v14  ;;  %2913 = vmatpush3.msra.mxu0 %v4186_v60 }
 0x5e4   :  { %1853 = vmatprep.subr.mxu1 %v4189_v62  ;;  %2914 = vmatprep.subr.mxu0 %v4646_v40 }
 0x5e5   :  { %1854 = vmatpush1.msra.mxu1 %v4193_v54  ;;  %2915 = vmatpush3.msra.mxu0 %v4196_v61 }
 0x5e6   :  { %1855 = vmatprep.subr.mxu1 %v4199_v35  ;;  %2916 = vmatprep.subr.mxu0 %v4646_v40 }
 0x5e7   :  { %1856 = vmatpush1.msra.mxu1 %v4203_v36  ;;  %2917 = vmatpush3.msra.mxu0 %v4206_v51 }
 0x5e8   :  { %1857 = vmatprep.subr.mxu1 %v4209_v17  ;;  %2918 = vmatprep.subr.mxu0 %v4646_v40 }
 0x5e9   :  { %1858 = vmatpush1.msra.mxu1 %v4213_v18  ;;  %2919 = vmatpush3.msra.mxu0 %v4216_v20 }
 0x5ea   :  { %1859 = vmatprep.subr.mxu1 %v4219_v57  ;;  %2920 = vmatprep.subr.mxu0 %v4646_v40 }
 0x5eb   :  { %1860 = vmatpush1.msra.mxu1 %v4223_v39  ;;  %2921 = vmatpush3.msra.mxu0 %v4226_v41 }
 0x5ec   :  { %1861 = vmatprep.subr.mxu1 %v4229_v43  ;;  %2922 = vmatprep.subr.mxu0 %v4646_v40 }
 0x5ed   :  { %1862 = vmatpush1.msra.mxu1 %v4233_v44  ;;  %2923 = vmatpush3.msra.mxu0 %v4336_v26 }
 0x5ee   :  { %1863 = vmatprep.subr.mxu1 %v4237_v45  ;;  %2924 = vmatprep.subr.mxu0 %v4646_v40 }
 0x5ef   :  { %1864 = vmatpush1.msra.mxu1 %v4241_v42  ;;  %2925 = vmatpush3.msra.mxu0 %v4342_v29 }
 0x5f0   :  { %1865 = vmatprep.subr.mxu1 %v4245_v47  ;;  %2926 = vmatprep.subr.mxu0 %v4646_v40 }
 0x5f1   :  { %1866 = vmatpush1.msra.mxu1 %v4249_v0  ;;  %2927 = vmatpush3.msra.mxu0 %v4348_v33 }
 0x5f2   :  { %1867 = vmatprep.subr.mxu1 %v4253_v13  ;;  %2928 = vmatprep.subr.mxu0 %v4646_v40 }
 0x5f3   :  { %1868 = vmatpush1.msra.mxu1 %v4257_v1  ;;  %2929 = vmatpush3.msra.mxu0 %v4354_v27 }
 0x5f4   :  { %1869 = vmatprep.subr.mxu1 %v4261_v19  ;;  %2930 = vmatprep.subr.mxu0 %v4646_v40 }
 0x5f5   :  { %1870 = vmatpush1.msra.mxu1 %v4265_v6  ;;  %2931 = vmatpush3.msra.mxu0 %v4360_v23  ;;  %v4698_v6 = vld [vmem:[#allocation59_spill] sm:$0xff] }
 0x5f6   :  { %1871 = vmatprep.subr.mxu1 %v4269_v25  ;;  %2932 = vmatprep.subr.mxu0 %v4646_v40 }
 0x5f7   :  { %1872 = vmatpush1.msra.mxu1 %v4273_v8  ;;  %1905 = vmatprep.mubr.f32.mxu1 %v4646_v40 }
 0x5f8   :  { %2933 = vmatpush3.msra.mxu0 %v4367_v3  ;;  %2934 = vmatprep.mubr.msk.f32.mxu0 %vm3315_vm1, %v4646_v40 }
 0x5f9   :  { %2014 = vmatprep.subr.mxu1 %v4132_v38  ;;  %2937 = vmatprep.subr.mxu0 %v4646_v40 }
 0x698   :  { %v1734_v11 = vpop.f32.mrf.mxu1  ;;  %v1805_v31 = vpop.f32.mrf.mxu0 }
 0x699   :  { %v1809_v22 = vadd.f32 %v1734_v11, %v4696_v37  ;;  %v1823_v38 = vadd.f32 %v3882_v34, %v1805_v31  ;;  %v4700_v34 = vld [vmem:[#allocation23_spill] sm:$0xff] }
 0x69a   :  { %v2901_v7 = vpop.f32.mrf.mxu0  ;;  %v1736_v10 = vpop.f32.mrf.mxu1  ;;  %v2178_v31 = vld [vmem:[#allocation9] sm:$0xff] }
 0x69b   :  { %v2426_v9 = vmul.f32 -1.442695, %v1809_v22  ;;  %v1810_v5 = vadd.f32 %v1736_v10, %v4697_v2 }
 0x69d   :  { %3113 = vpow2.f32 %v2426_v9  ;;  %v2427_v24 = vmul.f32 -1.442695, %v1810_v5  ;;  %v2276_v5 = vld [vmem:[#allocation11 + $0x20] sm:$0xff] }
 0x69f   :  { %3115 = vpow2.f32 %v2427_v24  ;;  %v2287_v24 = vld [vmem:[#allocation11 + $0x78] sm:$0xff] }
 0x6aa   :  { %v3114_v21 = vpop.eup %3113 }
 0x6ab   :  { %v1817_v49 = vadd.f32 1.0, %v3114_v21  ;;  %v2286_v21 = vld [vmem:[#allocation11 + $0x70] sm:$0xff] }
 0x6ac   :  { %v3116_v3 = vpop.eup %3115 }
 0x6ad   :  { %3117 = vrcp.f32 %v1817_v49  ;;  %v1818_v8 = vadd.f32 1.0, %v3116_v3  ;;  %v2285_v49 = vld [vmem:[#allocation11 + $0x68] sm:$0xff] }
 0x6af   :  { %3119 = vrcp.f32 %v1818_v8  ;;  %v2185_v8 = vld [vmem:[#allocation9 + $0x38] sm:$0xff] }
 0x6ba   :  { %v3118_v25 = vpop.eup %3117 }
 0x6bb   :  { %v1824_v23 = vmul.f32 %v3118_v25, %v1823_v38  ;;  %v2186_v25 = vld [vmem:[#allocation9 + $0x40] sm:$0xff] }
 0x6bc   :  { %v3120_v37 = vpop.eup %3119  ;;  %v2284_v38 = vld [vmem:[#allocation11 + $0x60] sm:$0xff] }
 0x6bd   :  { %v1825_v11 = vadd.f32 %v1824_v23, %v4698_v6  ;;  %v1827_v22 = vsub.f32 1.0, %v3120_v37  ;;  %v1829_v10 = vmul.f32 %v3120_v37, %v4291_v15  ;;  %v2187_v6 = vld [vmem:[#allocation9 + $0x48] sm:$0xff]  ;;  %v2282_v37 = vld [vmem:[#allocation11 + $0x50] sm:$0xff] }
 0x6be   :  { %v2179_v23 = vld [vmem:[#allocation9 + $0x8] sm:$0xff] }
 0x6bf   :  { %3121 = vtanh.f32 %v1825_v11  ;;  %v2283_v11 = vld [vmem:[#allocation11 + $0x58] sm:$0xff] }
 0x6cc   :  { %v3122_v7 = vpop.eup %3121 }
 0x6cd   :  { %v1828_v9 = vmul.f32 %v3122_v7, %v1827_v22  ;;  %v2281_v22 = vld [vmem:[#allocation11 + $0x48] sm:$0xff]  ;;  %v2280_v7 = vld [vmem:[#allocation11 + $0x40] sm:$0xff] }
 0x6cf   :  { %v1830_v2 = vadd.f32 %v1829_v10, %v1828_v9  ;;  %v2279_v9 = vld [vmem:[#allocation11 + $0x38] sm:$0xff]  ;;  %v2278_v10 = vld [vmem:[#allocation11 + $0x30] sm:$0xff] }
 0x6d1   :  { %v4383_v3 = vsel %vm737_vm14, %v1830_v2, %v4291_v15  ;;  %v2184_v15 = vld [vmem:[#allocation9 + $0x30] sm:$0xff]  ;;  %v2277_v2 = vld [vmem:[#allocation11 + $0x28] sm:$0xff] }
 0x6d2   :  { %1906 = vmatmul.mubr.f32.vlgmr.msra.gmra.mxu1 %v4383_v3  ;;  %2935 = vmatmul.mubr.f32.vlgmr.msra.gmra.mxu0 %v4383_v3 }
 0x6d3   :  { %2015 = vmatpush1.msra.mxu1 %v4051_v46  ;;  %2938 = vmatpush3.msra.mxu0 %v4150_v28  ;;  %v4701_v46 = vld [vmem:[#allocation25_spill] sm:$0xff] }
 0x6d4   :  { %2016 = vmatprep.subr.mxu1 %v4055_v12  ;;  %2939 = vmatprep.subr.mxu0 %v4646_v40  ;;  %v4702_v12 = vld [vmem:[#allocation38_spill] sm:$0xff] }
 0x6d5   :  { %2017 = vmatpush1.msra.mxu1 %v4059_v55  ;;  %2940 = vmatpush3.msra.mxu0 %v4156_v30  ;;  %v4703_v55 = vld [vmem:[#allocation24_spill] sm:$0xff] }
 0x6d6   :  { %2018 = vmatprep.subr.mxu1 %v4063_v50  ;;  %2941 = vmatprep.subr.mxu0 %v4646_v40  ;;  %v4704_v50 = vld [vmem:[#allocation39_spill] sm:$0xff] }
 0x6d7   :  { %2019 = vmatpush1.msra.mxu1 %v4067_v52  ;;  %2942 = vmatpush3.msra.mxu0 %v4162_v32 }
 0x6d8   :  { %2020 = vmatprep.subr.mxu1 %v4071_v58  ;;  %2943 = vmatprep.subr.mxu0 %v4646_v40 }
 0x6d9   :  { %2021 = vmatpush1.msra.mxu1 %v4075_v59  ;;  %2944 = vmatpush3.msra.mxu0 %v4168_v4  ;;  %v4705_v59 = vld [vmem:[#allocation46_spill] sm:$0xff]  ;;  %v4706_v4 = vld [vmem:[#allocation47_spill] sm:$0xff] }
 0x6da   :  { %2022 = vmatprep.subr.mxu1 %v4079_v63  ;;  %2945 = vmatprep.subr.mxu0 %v4646_v40 }
 0x6db   :  { %2023 = vmatpush1.msra.mxu1 %v4173_v53  ;;  %2946 = vmatpush3.msra.mxu0 %v4176_v48 }
 0x6dc   :  { %2024 = vmatprep.subr.mxu1 %v4179_v56  ;;  %2947 = vmatprep.subr.mxu0 %v4646_v40 }
 0x6dd   :  { %2025 = vmatpush1.msra.mxu1 %v4183_v14  ;;  %2948 = vmatpush3.msra.mxu0 %v4186_v60 }
 0x6de   :  { %2026 = vmatprep.subr.mxu1 %v4189_v62  ;;  %2949 = vmatprep.subr.mxu0 %v4646_v40 }
 0x6df   :  { %2027 = vmatpush1.msra.mxu1 %v4193_v54  ;;  %2950 = vmatpush3.msra.mxu0 %v4196_v61  ;;  %v4459_v54 = vld [vmem:[%s4529_s5] ss:$0 sm:$0xff] }
 0x6e0   :  { %2028 = vmatprep.subr.mxu1 %v4199_v35  ;;  %2951 = vmatprep.subr.mxu0 %v4646_v40 }
 0x6e1   :  { %2029 = vmatpush1.msra.mxu1 %v4203_v36  ;;  %2952 = vmatpush3.msra.mxu0 %v4206_v51  ;;  %v4707_v51 = vld [vmem:[#allocation53_spill] sm:$0xff] }
 0x6e2   :  { %2030 = vmatprep.subr.mxu1 %v4209_v17  ;;  %2953 = vmatprep.subr.mxu0 %v4646_v40 }
 0x6e3   :  { %2031 = vmatpush1.msra.mxu1 %v4213_v18  ;;  %2954 = vmatpush3.msra.mxu0 %v4216_v20 }
 0x6e4   :  { %2032 = vmatprep.subr.mxu1 %v4219_v57  ;;  %2955 = vmatprep.subr.mxu0 %v4646_v40 }
 0x6e5   :  { %2033 = vmatpush1.msra.mxu1 %v4223_v39  ;;  %2956 = vmatpush3.msra.mxu0 %v4226_v41 }
 0x6e6   :  { %2034 = vmatprep.subr.mxu1 %v4229_v43  ;;  %2957 = vmatprep.subr.mxu0 %v4646_v40 }
 0x6e7   :  { %2035 = vmatpush1.msra.mxu1 %v4233_v44  ;;  %2958 = vmatpush3.msra.mxu0 %v4336_v26  ;;  %v2183_v26 = vld [vmem:[#allocation9 + $0x28] sm:$0xff] }
 0x6e8   :  { %2036 = vmatprep.subr.mxu1 %v4237_v45  ;;  %2959 = vmatprep.subr.mxu0 %v4646_v40 }
 0x6e9   :  { %2037 = vmatpush1.msra.mxu1 %v4241_v42  ;;  %2960 = vmatpush3.msra.mxu0 %v4342_v29  ;;  %v2193_v42 = vld [vmem:[#allocation9 + $0x78] sm:$0xff]  ;;  %v2182_v29 = vld [vmem:[#allocation9 + $0x20] sm:$0xff] }
 0x6ea   :  { %2038 = vmatprep.subr.mxu1 %v4245_v47  ;;  %2961 = vmatprep.subr.mxu0 %v4646_v40  ;;  %v2192_v47 = vld [vmem:[#allocation9 + $0x70] sm:$0xff] }
 0x6eb   :  { %2039 = vmatpush1.msra.mxu1 %v4249_v0  ;;  %2962 = vmatpush3.msra.mxu0 %v4348_v33  ;;  %v2191_v0 = vld [vmem:[#allocation9 + $0x68] sm:$0xff]  ;;  %v2181_v33 = vld [vmem:[#allocation9 + $0x18] sm:$0xff] }
 0x6ec   :  { %2040 = vmatprep.subr.mxu1 %v4253_v13  ;;  %2963 = vmatprep.subr.mxu0 %v4646_v40  ;;  %v2190_v13 = vld [vmem:[#allocation9 + $0x60] sm:$0xff] }
 0x6ed   :  { %2041 = vmatpush1.msra.mxu1 %v4257_v1  ;;  %2964 = vmatpush3.msra.mxu0 %v4354_v27  ;;  %v2189_v1 = vld [vmem:[#allocation9 + $0x58] sm:$0xff]  ;;  %v2180_v27 = vld [vmem:[#allocation9 + $0x10] sm:$0xff] }
 0x6ee   :  { %2042 = vmatprep.subr.mxu1 %v4261_v19  ;;  %2965 = vmatprep.subr.mxu0 %v4646_v40  ;;  %v2188_v19 = vld [vmem:[#allocation9 + $0x50] sm:$0xff] }
 0x6ef   :  { %2043 = vmatpush1.msra.mxu1 %v4700_v34  ;;  %2966 = vmatpush3.msra.mxu0 %v4701_v46 }
 0x6f0   :  { %2044 = vmatprep.subr.mxu1 %v4702_v12  ;;  %2967 = vmatprep.subr.mxu0 %v4646_v40  ;;  %v4709_v12 = vld [vmem:[#allocation48_spill] sm:$0xff] }
 0x6f1   :  { %2045 = vmatpush1.msra.mxu1 %v4703_v55  ;;  %2078 = vmatprep.mubr.f32.mxu1 %v4646_v40 }
 0x6f2   :  { %2968 = vmatpush3.msra.mxu0 %v4704_v50  ;;  %2969 = vmatprep.mubr.msk.f32.mxu0 %vm3315_vm1, %v4646_v40 }
 0x6f3   :  { %2972 = vmatprep.subr.mxu1 %v4646_v40  ;;  %3007 = vmatprep.subr.mxu0 %v4646_v40 }
 0x792   :  { %v1907_v52 = vpop.f32.mrf.mxu1  ;;  %v1978_v58 = vpop.f32.mrf.mxu0 }
 0x793   :  { %v1982_v63 = vadd.f32 %v1907_v52, %v4705_v59  ;;  %v1996_v61 = vadd.f32 %v4459_v54, %v1978_v58  ;;  %v4710_v59 = vld [vmem:[#allocation50_spill] sm:$0xff] }
 0x794   :  { %v2936_v28 = vpop.f32.mrf.mxu0  ;;  %v1909_v32 = vpop.f32.mrf.mxu1 }
 0x795   :  { %v2428_v30 = vmul.f32 -1.442695, %v1982_v63  ;;  %v1983_v53 = vadd.f32 %v1909_v32, %v4706_v4 }
 0x797   :  { %3123 = vpow2.f32 %v2428_v30  ;;  %v2429_v48 = vmul.f32 -1.442695, %v1983_v53 }
 0x799   :  { %3125 = vpow2.f32 %v2429_v48 }
 0x7a4   :  { %v3124_v56 = vpop.eup %3123 }
 0x7a5   :  { %v1990_v14 = vadd.f32 1.0, %v3124_v56 }
 0x7a6   :  { %v3126_v60 = vpop.eup %3125 }
 0x7a7   :  { %3127 = vrcp.f32 %v1990_v14  ;;  %v1991_v62 = vadd.f32 1.0, %v3126_v60  ;;  %v4711_v60 = vld [vmem:[#allocation55_spill] sm:$0xff] }
 0x7a9   :  { %3129 = vrcp.f32 %v1991_v62 }
 0x7b4   :  { %v3128_v35 = vpop.eup %3127 }
 0x7b5   :  { %v1997_v36 = vmul.f32 %v3128_v35, %v1996_v61 }
 0x7b6   :  { %v3130_v18 = vpop.eup %3129 }
 0x7b7   :  { %v1998_v17 = vadd.f32 %v1997_v36, %v4707_v51  ;;  %v2000_v20 = vsub.f32 1.0, %v3130_v18  ;;  %v2002_v41 = vmul.f32 %v3130_v18, %v4383_v3 }
 0x7b9   :  { %3131 = vtanh.f32 %v1998_v17 }
 0x7c6   :  { %v3132_v57 = vpop.eup %3131 }
 0x7c7   :  { %v2001_v39 = vmul.f32 %v3132_v57, %v2000_v20 }
 0x7c9   :  { %v2003_v43 = vadd.f32 %v2002_v41, %v2001_v39  ;;  %v2273_v39 = vld [vmem:[#allocation11 + $0x8] sm:$0xff]  ;;  %v2272_v41 = vld [vmem:[#allocation11] sm:$0xff] }
 0x7cb   :  { %v4468_v45 = vsel %vm738_vm15, %v2003_v43, %v4383_v3  ;;  %v2275_v3 = vld [vmem:[#allocation11 + $0x18] sm:$0xff]  ;;  %v2432_v43 = vld [vmem:[%s4531_s7] ss:$0 sm:$0xff] }
 0x7cc   :  { %2079 = vmatmul.mubr.f32.vlgmr.msra.gmra.mxu1 %v4468_v45  ;;  %2970 = vmatmul.mubr.f32.vlgmr.msra.gmra.mxu0 %v4468_v45 }
 0x7cd   :  { %3004 = vmatprep.mubr.msk.f32.mxu1 %vm3315_vm1, %v4646_v40  ;;  %3039 = vmatprep.mubr.msk.f32.mxu0 %vm3315_vm1, %v4646_v40 }
 0x7ce   :  { %2973 = vmatpush3.msra.mxu1 %v2193_v42  ;;  %3008 = vmatpush3.msra.mxu0 %v2287_v24 }
 0x7cf   :  { %2974 = vmatprep.subr.mxu1 %v4646_v40  ;;  %3009 = vmatprep.subr.mxu0 %v4646_v40 }
 0x7d0   :  { %2975 = vmatpush3.msra.mxu1 %v2192_v47  ;;  %3010 = vmatpush3.msra.mxu0 %v2286_v21 }
 0x7d1   :  { %2976 = vmatprep.subr.mxu1 %v4646_v40  ;;  %3011 = vmatprep.subr.mxu0 %v4646_v40 }
 0x7d2   :  { %2977 = vmatpush3.msra.mxu1 %v2191_v0  ;;  %3012 = vmatpush3.msra.mxu0 %v2285_v49 }
 0x7d3   :  { %2978 = vmatprep.subr.mxu1 %v4646_v40  ;;  %3013 = vmatprep.subr.mxu0 %v4646_v40 }
 0x7d4   :  { %2979 = vmatpush3.msra.mxu1 %v2190_v13  ;;  %3014 = vmatpush3.msra.mxu0 %v2284_v38 }
 0x7d5   :  { %2980 = vmatprep.subr.mxu1 %v4646_v40  ;;  %3015 = vmatprep.subr.mxu0 %v4646_v40 }
 0x7d6   :  { %2981 = vmatpush3.msra.mxu1 %v2189_v1  ;;  %3016 = vmatpush3.msra.mxu0 %v2283_v11 }
 0x7d7   :  { %2982 = vmatprep.subr.mxu1 %v4646_v40  ;;  %3017 = vmatprep.subr.mxu0 %v4646_v40 }
 0x7d8   :  { %2983 = vmatpush3.msra.mxu1 %v2188_v19  ;;  %3018 = vmatpush3.msra.mxu0 %v2282_v37 }
 0x7d9   :  { %2984 = vmatprep.subr.mxu1 %v4646_v40  ;;  %3019 = vmatprep.subr.mxu0 %v4646_v40 }
 0x7da   :  { %2985 = vmatpush3.msra.mxu1 %v2187_v6  ;;  %3020 = vmatpush3.msra.mxu0 %v2281_v22 }
 0x7db   :  { %2986 = vmatprep.subr.mxu1 %v4646_v40  ;;  %3021 = vmatprep.subr.mxu0 %v4646_v40 }
 0x7dc   :  { %2987 = vmatpush3.msra.mxu1 %v2186_v25  ;;  %3022 = vmatpush3.msra.mxu0 %v2280_v7 }
 0x7dd   :  { %2988 = vmatprep.subr.mxu1 %v4646_v40  ;;  %3023 = vmatprep.subr.mxu0 %v4646_v40 }
 0x7de   :  { %2989 = vmatpush3.msra.mxu1 %v2185_v8  ;;  %3024 = vmatpush3.msra.mxu0 %v2279_v9 }
 0x7df   :  { %2990 = vmatprep.subr.mxu1 %v4646_v40  ;;  %3025 = vmatprep.subr.mxu0 %v4646_v40 }
 0x7e0   :  { %2991 = vmatpush3.msra.mxu1 %v2184_v15  ;;  %3026 = vmatpush3.msra.mxu0 %v2278_v10 }
 0x7e1   :  { %2992 = vmatprep.subr.mxu1 %v4646_v40  ;;  %3027 = vmatprep.subr.mxu0 %v4646_v40 }
 0x7e2   :  { %2993 = vmatpush3.msra.mxu1 %v2183_v26  ;;  %3028 = vmatpush3.msra.mxu0 %v2277_v2 }
 0x7e3   :  { %2994 = vmatprep.subr.mxu1 %v4646_v40  ;;  %3029 = vmatprep.subr.mxu0 %v4646_v40 }
 0x7e4   :  { %2995 = vmatpush3.msra.mxu1 %v2182_v29  ;;  %3030 = vmatpush3.msra.mxu0 %v2276_v5 }
 0x7e5   :  { %2996 = vmatprep.subr.mxu1 %v4646_v40  ;;  %3031 = vmatprep.subr.mxu0 %v4646_v40 }
 0x7e6   :  { %2997 = vmatpush3.msra.mxu1 %v2181_v33  ;;  %3032 = vmatpush3.msra.mxu0 %v2275_v3 }
 0x7e7   :  { %2998 = vmatprep.subr.mxu1 %v4646_v40  ;;  %3033 = vmatprep.subr.mxu0 %v4646_v40 }
 0x7e8   :  { %2999 = vmatpush3.msra.mxu1 %v2180_v27 }
 0x7e9   :  { %3000 = vmatprep.subr.mxu1 %v4646_v40 }
 0x7ea   :  { %3001 = vmatpush3.msra.mxu1 %v2179_v23 }
 0x7eb   :  { %3002 = vmatprep.subr.mxu1 %v4646_v40 }
 0x7ec   :  { %3003 = vmatpush3.msra.mxu1 %v2178_v31 }
 0x88c   :  { %v2080_v34 = vpop.f32.mrf.mxu1  ;;  %v2151_v46 = vpop.f32.mrf.mxu0 }
 0x88d   :  { %v2155_v55 = vadd.f32 %v2080_v34, %v4709_v12  ;;  %v2169_v48 = vadd.f32 %v4459_v54, %v2151_v46  ;;  %v2274_v54 = vld [vmem:[#allocation11 + $0x10] sm:$0xff] }
 0x88e   :  { %v2971_v50 = vpop.f32.mrf.mxu0  ;;  %v2082_v58 = vpop.f32.mrf.mxu1  ;;  %3034 = vmatpush3.msra.mxu0 %v2274_v54 }
 0x88f   :  { %v2430_v52 = vmul.f32 -1.442695, %v2155_v55  ;;  %v2156_v63 = vadd.f32 %v2082_v58, %v4710_v59  ;;  %3035 = vmatprep.subr.mxu0 %v4646_v40 }
 0x890   :  { %3036 = vmatpush3.msra.mxu0 %v2273_v39 }
 0x891   :  { %3133 = vpow2.f32 %v2430_v52  ;;  %v2431_v28 = vmul.f32 -1.442695, %v2156_v63  ;;  %3037 = vmatprep.subr.mxu0 %v4646_v40 }
 0x892   :  { %3038 = vmatpush3.msra.mxu0 %v2272_v41 }
 0x893   :  { %3135 = vpow2.f32 %v2431_v28 }
 0x89e   :  { %v3134_v30 = vpop.eup %3133 }
 0x89f   :  { %v2163_v32 = vadd.f32 1.0, %v3134_v30 }
 0x8a0   :  { %v3136_v4 = vpop.eup %3135 }
 0x8a1   :  { %3137 = vrcp.f32 %v2163_v32  ;;  %v2164_v53 = vadd.f32 1.0, %v3136_v4 }
 0x8a3   :  { %3139 = vrcp.f32 %v2164_v53 }
 0x8ae   :  { %v3138_v56 = vpop.eup %3137 }
 0x8af   :  { %v2170_v14 = vmul.f32 %v3138_v56, %v2169_v48 }
 0x8b0   :  { %v3140_v61 = vpop.eup %3139 }
 0x8b1   :  { %v2171_v62 = vadd.f32 %v2170_v14, %v4711_v60  ;;  %v2173_v35 = vsub.f32 1.0, %v3140_v61  ;;  %v2175_v17 = vmul.f32 %v3140_v61, %v4468_v45 }
 0x8b3   :  { %3141 = vtanh.f32 %v2171_v62 }
 0x8c0   :  { %v3142_v36 = vpop.eup %3141 }
 0x8c1   :  { %v2174_v51 = vmul.f32 %v3142_v36, %v2173_v35 }
 0x8c3   :  { %v2176_v18 = vadd.f32 %v2175_v17, %v2174_v51 }
 0x8c5   :  { %v2177_v57 = vsel %vm739_vm2, %v2176_v18, %v4468_v45  ;;  %v2433_v45 = vld [vmem:[%s4533_s9] ss:$0 sm:$0xff] }
 0x8c6   :  { %3005 = vmatmul.mubr.f32.vlgmr.msra.gmra.mxu1 %v2177_v57 }
 0x986   :  { %v2267_v44 = vpop.f32.mrf.mxu1 }
 0x987   :  { %v2268_v42 = vadd.f32 %v2432_v43, %v2267_v44 }
 0x988   :  { %v3006_v47 = vpop.f32.mrf.mxu1 }
 0x989   :  { %v2271_v16 = vmax.f32 %v2268_v42, 0.0 }
 0x98b   :  { %3040 = vmatmul.mubr.f32.vlgmr.msra.gmra.mxu0 %v2271_v16 }
 0xa4b   :  { %v2361_v0 = vpop.f32.mrf.mxu0 }
 0xa4c   :  { %v2362_v13 = vadd.f32 %v2433_v45, %v2361_v0 }
 0xa4d   :  { %v3041_v1 = vpop.f32.mrf.mxu0 }
 0xa4e   :  { %2365 = vst [vmem:[%s4534_s10] sm:$0xff] %v2362_v13 }
 0xa4f   :  { %2370 = vsyncpa [#allocation5], 1 }
 0xa50   :  { %2371 = vsyncpa [#allocation7], 1 }
 0xa51   :  { %2372 = vsyncpa [#allocation10], 1 }

</bundles_post_ra>
